<compile_context>
chip_gen: v6e
topology: v6e:2x2x1
jax: 0.10.0
libtpu: 0.0.40
codegen_flags: <defaults>
</compile_context>

<pallas_src>
import jax
import jax.numpy as jnp
from jax import lax
from jax.experimental import pallas as pl
from jax.experimental.pallas import tpu as pltpu


def _round_up(n, m):
    return (n + m - 1) // m * m


def _cdiv(a, b):
    return -(-a // b)


def _rnn_fc_kernel(x_ref, wih0_ref, wihr_ref, whh_ref, b_ref, fcw_ref, fcb_ref,
                   out_ref, pre0_ref, pre1_ref):
    """One batch tile, all layers, all timesteps.

    x_ref    : (T*bt, I)       bf16  time-major, flattened input tile
    wih0_ref : (I, Hp)         bf16  layer-0 input->hidden weight (transposed)
    wihr_ref : (L-1, Hp, Hp)   bf16  layers>=1 input->hidden weights (transposed)
                                     (dummy (1,8,128) when L==1; never read)
    whh_ref  : (L, Hp, Hp)     bf16  hidden->hidden weights (transposed)
    b_ref    : (L, 1, Hp)      f32   b_ih + b_hh per layer
    fcw_ref  : (Hp, Op)        bf16  final Linear weight (transposed)
    fcb_ref  : (1, Op)         f32   final Linear bias
    out_ref  : (bt, Op)        f32
    pre0/1   : (T*bt, Hp)      f32   ping-pong input-projection scratch
    """
    L = whh_ref.shape[0]
    bt = out_ref.shape[0]
    TB, H = pre0_ref.shape
    T = TB // bt
    bf16 = jnp.bfloat16

    # Hoist the (Hp,Hp) RHS into a value only while it fits comfortably in
    # vregs (8 bf16 vregs at Hp=128); beyond that, stream it from VMEM.
    hoist_rhs = H <= 128

    # Layer 0 input projection, hoisted out of the time loop: one large MXU
    # matmul over all T timesteps of this batch tile (f32 accumulate).
    pre0_ref[...] = (jnp.dot(x_ref[...], wih0_ref[...],
                             preferred_element_type=jnp.float32)
                     + b_ref[0])

    pre_bufs = (pre0_ref, pre1_ref)
    h_last = None
    for l in range(L):  # static unroll over layers (layer_size is small)
        pre_cur = pre_bufs[l % 2]
        pre_nxt = pre_bufs[(l + 1) % 2]
        has_next = l < L - 1

        w_hh_val = whh_ref[l] if hoist_rhs else None
        w_ihn_val = None
        b_next = None
        if has_next:
            b_next = b_ref[l + 1]
            if hoist_rhs:
                w_ihn_val = wihr_ref[l]

        def step(t, h, l=l, pre_cur=pre_cur, pre_nxt=pre_nxt,
                 has_next=has_next, w_hh_val=w_hh_val,
                 w_ihn_val=w_ihn_val, b_next=b_next):
            row = pl.multiple_of(t * bt, bt)
            pre_t = pre_cur[pl.ds(row, bt), :]
            w_hh = w_hh_val if w_hh_val is not None else whh_ref[l]
            h_new = jnp.maximum(
                jnp.dot(h.astype(bf16), w_hh,
                        preferred_element_type=jnp.float32) + pre_t,
                0.0)
            if has_next:
                # Fuse the NEXT layer's input projection for this timestep into
                # the serial chain: an independent matmul that keeps the MXU
                # busy while the recurrence waits on its own result.
                w_ihn = w_ihn_val if w_ihn_val is not None else wihr_ref[l]
                pre_nxt[pl.ds(row, bt), :] = (
                    jnp.dot(h_new.astype(bf16), w_ihn,
                            preferred_element_type=jnp.float32) + b_next)
            return h_new

        h_last = lax.fori_loop(0, T, step,
                               jnp.zeros((bt, H), jnp.float32),
                               unroll=True)

    # output[:, -1, :] of the top layer is exactly h_last.
    out_ref[...] = (jnp.dot(h_last.astype(bf16), fcw_ref[...],
                            preferred_element_type=jnp.float32)
                    + fcb_ref[...])


def multilayer_rnn_mnist_forward(x, params):
    """x: (B, T, input_size) float32 (batch-first, like the PyTorch module).

    params: (layers, (fc_w, fc_b)) with PyTorch-shaped tensors:
      layers[l] = (w_ih (H, in_dim), w_hh (H, H), b_ih (H,), b_hh (H,))
      fc_w (O, H), fc_b (O,)
    Returns (B, output_size) float32.
    """
    layers, (fc_w, fc_b) = params
    B, T, I = x.shape
    L = len(layers)
    H = layers[0][1].shape[0]
    O = fc_w.shape[0]

    # Hardware-friendly padded sizes.
    Hp = _round_up(H, 128)
    Op = _round_up(O, 128)

    # Batch tiling: target up to 256 rows per tile (fills the MXU during the
    # serial recurrence) and pad the batch up to nb*bt.  Whenever the padded
    # batch exceeds one tile we get nb >= 2 tiles (both v7x TensorCores busy).
    BT_TARGET = 256
    Bp8 = _round_up(B, 8)
    if Bp8 <= BT_TARGET:
        bt, nb = Bp8, 1
    else:
        nb = _cdiv(Bp8, BT_TARGET)
        bt = _round_up(_cdiv(Bp8, nb), 8)
        nb = _cdiv(Bp8, bt)
    Bp = nb * bt

    f32, bf16 = jnp.float32, jnp.bfloat16

    # ---- pack parameters (transposed, zero-padded, bf16 matmul operands) ----
    wih0_t = jnp.zeros((I, Hp), f32).at[:, :H].set(layers[0][0].T).astype(bf16)
    if L > 1:
        wihr_t = jnp.stack(
            [jnp.zeros((Hp, Hp), f32).at[:H, :H].set(layers[l][0].T)
             for l in range(1, L)]).astype(bf16)
    else:
        wihr_t = jnp.zeros((1, 8, 128), bf16)  # tiny dummy, never read
    whh_t = jnp.stack(
        [jnp.zeros((Hp, Hp), f32).at[:H, :H].set(layers[l][1].T)
         for l in range(L)]).astype(bf16)
    bias = jnp.stack(
        [jnp.zeros((1, Hp), f32).at[0, :H].set(layers[l][2] + layers[l][3])
         for l in range(L)])
    fcw_t = jnp.zeros((Hp, Op), f32).at[:H, :O].set(fc_w.T).astype(bf16)
    fcb_p = jnp.zeros((1, Op), f32).at[0, :O].set(fc_b)

    # ---- input: pad batch, go time-major, group by batch tile, flatten ----
    x_p = jnp.pad(x.astype(f32), ((0, Bp - B), (0, 0), (0, 0)))        # (Bp,T,I)
    x_tm = jnp.transpose(x_p, (1, 0, 2))                               # (T,Bp,I)
    x_g = (x_tm.reshape(T, nb, bt, I)
               .transpose(1, 0, 2, 3)
               .reshape(nb, T * bt, I)).astype(bf16)                   # (nb,T*bt,I)

    # ---- VMEM budget: scratch + double-buffered weights / I/O tiles ----
    scratch_bytes = 2 * (T * bt * Hp * 4)
    weight_bytes = (2 * (wih0_t.size + wihr_t.size + whh_t.size + fcw_t.size)
                    + 4 * (bias.size + fcb_p.size))
    io_bytes = 2 * (T * bt * I * 2) + 2 * (bt * Op * 4)
    need = scratch_bytes + 2 * weight_bytes + io_bytes + (2 << 20)
    try:
        vmem_cap = int(pltpu.get_tpu_info().vmem_capacity_bytes)
    except Exception:
        vmem_cap = 64 * 1024 * 1024  # v7x per-TensorCore floor
    vmem_limit = int(min(max(need, 32 * 1024 * 1024), vmem_cap))

    pre1_shape = (T * bt, Hp) if L > 1 else (8, 128)  # ping-pong buffer (dummy if L==1)

    out = pl.pallas_call(
        _rnn_fc_kernel,
        out_shape=jax.ShapeDtypeStruct((nb, bt, Op), f32),
        grid=(nb,),
        in_specs=[
            pl.BlockSpec((None, T * bt, I), lambda b: (b, 0, 0)),   # x tile
            pl.BlockSpec((I, Hp), lambda b: (0, 0)),                # wih0
            pl.BlockSpec(wihr_t.shape, lambda b: (0, 0, 0)),        # wih rest
            pl.BlockSpec((L, Hp, Hp), lambda b: (0, 0, 0)),         # whh
            pl.BlockSpec((L, 1, Hp), lambda b: (0, 0, 0)),          # bias
            pl.BlockSpec((Hp, Op), lambda b: (0, 0)),               # fc w
            pl.BlockSpec((1, Op), lambda b: (0, 0)),                # fc b
        ],
        out_specs=pl.BlockSpec((None, bt, Op), lambda b: (b, 0, 0)),
        scratch_shapes=[pltpu.VMEM((T * bt, Hp), f32),   # pre (current layer)
                        pltpu.VMEM(pre1_shape, f32)],    # pre (next layer)
        compiler_params=pltpu.CompilerParams(
            dimension_semantics=("parallel",),
            vmem_limit_bytes=vmem_limit),
    )(x_g, wih0_t, wihr_t, whh_t, bias, fcw_t, fcb_p)

    return out.reshape(Bp, Op)[:B, :O]


def init_params(key, input_size, hidden_size, layer_size, output_size):
    """PyTorch-style U(-1/sqrt(H), 1/sqrt(H)) init; PyTorch-shaped tensors."""
    H, I, L, O = hidden_size, input_size, layer_size, output_size
    k = 1.0 / float(H) ** 0.5
    keys = jax.random.split(key, 4 * L + 2)
    layers = []
    idx = 0
    for l in range(L):
        in_dim = I if l == 0 else H
        w_ih = jax.random.uniform(keys[idx], (H, in_dim), jnp.float32, -k, k); idx += 1
        w_hh = jax.random.uniform(keys[idx], (H, H), jnp.float32, -k, k);      idx += 1
        b_ih = jax.random.uniform(keys[idx], (H,), jnp.float32, -k, k);        idx += 1
        b_hh = jax.random.uniform(keys[idx], (H,), jnp.float32, -k, k);        idx += 1
        layers.append((w_ih, w_hh, b_ih, b_hh))
    fc_w = jax.random.uniform(keys[idx], (O, H), jnp.float32, -k, k); idx += 1
    fc_b = jax.random.uniform(keys[idx], (O,), jnp.float32, -k, k)
    return layers, (fc_w, fc_b)


def reference_forward(x, params):
    """Pure-JAX f32 reference mirroring torch.nn.RNN(relu) + Linear semantics."""
    layers, (fc_w, fc_b) = params
    B, T, _ = x.shape
    H = layers[0][1].shape[0]
    seq = x
    for (w_ih, w_hh, b_ih, b_hh) in layers:
        h = jnp.zeros((B, H), jnp.float32)
        outs = []
        for t in range(T):
            h = jnp.maximum(seq[:, t, :] @ w_ih.T + h @ w_hh.T + b_ih + b_hh, 0.0)
            outs.append(h)
        seq = jnp.stack(outs, axis=1)
    return seq[:, -1, :] @ fc_w.T + fc_b


if __name__ == "__main__":
    # Small shapes consistent with the module's forward:
    # images: (batch, seq_len, input_size)
    B, T = 2, 8
    input_size, hidden_size, layer_size, output_size = 16, 32, 2, 10

    key = jax.random.PRNGKey(0)
    k_x, k_p = jax.random.split(key)
    x = jax.random.normal(k_x, (B, T, input_size), dtype=jnp.float32)
    params = init_params(k_p, input_size, hidden_size, layer_size, output_size)

    out = multilayer_rnn_mnist_forward(x, params)
    out = jax.block_until_ready(out)

    ref = reference_forward(x, params)
    assert out.shape == (B, output_size)
    assert bool(jnp.all(jnp.isfinite(out)))
    # bf16 matmul operands with f32 accumulation -> loosened tolerance.
    assert jnp.allclose(out, ref, atol=3e-2, rtol=3e-2)

    print("KERNEL_OK")
</pallas_src>

<mosaic_0001>
module attributes {stable_mosaic.version = 11 : i64} {
  func.func @_rnn_fc_kernel(%arg0: i32, %arg1: memref<1x64x16xbf16, #tpu.memory_space<vmem>>, %arg2: memref<16x128xbf16, #tpu.memory_space<vmem>>, %arg3: memref<1x128x128xbf16, #tpu.memory_space<vmem>>, %arg4: memref<2x128x128xbf16, #tpu.memory_space<vmem>>, %arg5: memref<2x1x128xf32, #tpu.memory_space<vmem>>, %arg6: memref<128x128xbf16, #tpu.memory_space<vmem>>, %arg7: memref<1x128xf32, #tpu.memory_space<vmem>>, %arg8: memref<1x8x128xf32, #tpu.memory_space<vmem>>, %arg9: memref<64x128xf32, #tpu.memory_space<vmem>>, %arg10: memref<64x128xf32, #tpu.memory_space<vmem>>) attributes {dimension_semantics = [#tpu.dimension_semantics<parallel>], iteration_bounds = array<i64: 1>, scalar_prefetch = 0 : i64, scratch_operands = 2 : i64, tpu.core_type = #tpu.core_type<tc>, window_params = [{transform_indices = @transform_0, window_bounds = array<i64: 1, 64, 16>}, {pipeline_mode = #tpu.pipeline_mode<synchronous>, transform_indices = @transform_1, window_bounds = array<i64: 16, 128>}, {pipeline_mode = #tpu.pipeline_mode<synchronous>, transform_indices = @transform_2, window_bounds = array<i64: 1, 128, 128>}, {pipeline_mode = #tpu.pipeline_mode<synchronous>, transform_indices = @transform_3, window_bounds = array<i64: 2, 128, 128>}, {pipeline_mode = #tpu.pipeline_mode<synchronous>, transform_indices = @transform_4, window_bounds = array<i64: 2, 1, 128>}, {pipeline_mode = #tpu.pipeline_mode<synchronous>, transform_indices = @transform_5, window_bounds = array<i64: 128, 128>}, {pipeline_mode = #tpu.pipeline_mode<synchronous>, transform_indices = @transform_6, window_bounds = array<i64: 1, 128>}, {transform_indices = @transform_7, window_bounds = array<i64: 1, 8, 128>}]} {
    %c0 = arith.constant 0 : index
    %c0_0 = arith.constant 0 : index
    %c0_1 = arith.constant 0 : index
    %0 = vector.load %arg1[%c0, %c0_0, %c0_1] : memref<1x64x16xbf16, #tpu.memory_space<vmem>>, vector<1x64x16xbf16>
    %1 = vector.shape_cast %0 : vector<1x64x16xbf16> to vector<64x16xbf16>
    %c0_2 = arith.constant 0 : index
    %c0_3 = arith.constant 0 : index
    %2 = vector.load %arg2[%c0_2, %c0_3] : memref<16x128xbf16, #tpu.memory_space<vmem>>, vector<16x128xbf16>
    %cst = arith.constant dense<0.000000e+00> : vector<64x128xf32>
    %3 = tpu.matmul %1, %2, %cst {dimension_numbers = #tpu.dot_dimension_numbers<[1], [0], [0], [1], [0, 0, 1, 1], [], []>} : vector<64x16xbf16>, vector<16x128xbf16>, vector<64x128xf32> -> vector<64x128xf32>
    %c0_4 = arith.constant 0 : index
    %c0_5 = arith.constant 0 : index
    %c0_6 = arith.constant 0 : index
    %4 = vector.load %arg5[%c0_4, %c0_5, %c0_6] : memref<2x1x128xf32, #tpu.memory_space<vmem>>, vector<1x1x128xf32>
    %5 = vector.shape_cast %4 : vector<1x1x128xf32> to vector<1x128xf32>
    %6 = vector.broadcast %5 : vector<1x128xf32> to vector<64x128xf32>
    %7 = arith.addf %3, %6 : vector<64x128xf32>
    %c0_7 = arith.constant 0 : index
    %c0_8 = arith.constant 0 : index
    %8 = vector.load %arg9[%c0_7, %c0_8] : memref<64x128xf32, #tpu.memory_space<vmem>>, vector<64x128xf32>
    tpu.vector_store %arg9[%c0_7, %c0_8], %7 {strides = array<i32>} : memref<64x128xf32, #tpu.memory_space<vmem>>, vector<64x128xf32>,
    %c0_9 = arith.constant 0 : index
    %c0_10 = arith.constant 0 : index
    %c0_11 = arith.constant 0 : index
    %9 = vector.load %arg4[%c0_9, %c0_10, %c0_11] : memref<2x128x128xbf16, #tpu.memory_space<vmem>>, vector<1x128x128xbf16>
    %10 = vector.shape_cast %9 : vector<1x128x128xbf16> to vector<128x128xbf16>
    %c1 = arith.constant 1 : index
    %c0_12 = arith.constant 0 : index
    %c0_13 = arith.constant 0 : index
    %11 = vector.load %arg5[%c1, %c0_12, %c0_13] : memref<2x1x128xf32, #tpu.memory_space<vmem>>, vector<1x1x128xf32>
    %12 = vector.shape_cast %11 : vector<1x1x128xf32> to vector<1x128xf32>
    %c0_14 = arith.constant 0 : index
    %c0_15 = arith.constant 0 : index
    %c0_16 = arith.constant 0 : index
    %13 = vector.load %arg3[%c0_14, %c0_15, %c0_16] : memref<1x128x128xbf16, #tpu.memory_space<vmem>>, vector<1x128x128xbf16>
    %14 = vector.shape_cast %13 : vector<1x128x128xbf16> to vector<128x128xbf16>
    %cst_17 = arith.constant 0.000000e+00 : f32
    %15 = vector.broadcast %cst_17 : f32 to vector<8x128xf32>
    %c0_i32 = arith.constant 0 : i32
    %c8_i32 = arith.constant 8 : i32
    %16 = arith.muli %c0_i32, %c8_i32 : i32
    %17 = tpu.assume_multiple %16, 8 : i32
    %18 = arith.index_cast %17 : i32 to index
    %c0_18 = arith.constant 0 : index
    %19 = vector.load %arg9[%18, %c0_18] : memref<64x128xf32, #tpu.memory_space<vmem>>, vector<8x128xf32>
    %20 = arith.truncf %15 : vector<8x128xf32> to vector<8x128xbf16>
    %cst_19 = arith.constant dense<0.000000e+00> : vector<8x128xf32>
    %21 = tpu.matmul %20, %10, %cst_19 {dimension_numbers = #tpu.dot_dimension_numbers<[1], [0], [0], [1], [0, 0, 1, 1], [], []>} : vector<8x128xbf16>, vector<128x128xbf16>, vector<8x128xf32> -> vector<8x128xf32>
    %22 = arith.addf %21, %19 : vector<8x128xf32>
    %cst_20 = arith.constant 0.000000e+00 : f32
    %23 = vector.broadcast %cst_20 : f32 to vector<8x128xf32>
    %24 = arith.maximumf %22, %23 : vector<8x128xf32>
    %25 = arith.truncf %24 : vector<8x128xf32> to vector<8x128xbf16>
    %cst_21 = arith.constant dense<0.000000e+00> : vector<8x128xf32>
    %26 = tpu.matmul %25, %14, %cst_21 {dimension_numbers = #tpu.dot_dimension_numbers<[1], [0], [0], [1], [0, 0, 1, 1], [], []>} : vector<8x128xbf16>, vector<128x128xbf16>, vector<8x128xf32> -> vector<8x128xf32>
    %27 = vector.broadcast %12 : vector<1x128xf32> to vector<8x128xf32>
    %28 = arith.addf %26, %27 : vector<8x128xf32>
    %29 = arith.index_cast %17 : i32 to index
    %c0_22 = arith.constant 0 : index
    %30 = vector.load %arg10[%29, %c0_22] : memref<64x128xf32, #tpu.memory_space<vmem>>, vector<8x128xf32>
    tpu.vector_store %arg10[%29, %c0_22], %28 {strides = array<i32>} : memref<64x128xf32, #tpu.memory_space<vmem>>, vector<8x128xf32>,
    %c1_i32 = arith.constant 1 : i32
    %c8_i32_23 = arith.constant 8 : i32
    %31 = arith.muli %c1_i32, %c8_i32_23 : i32
    %32 = tpu.assume_multiple %31, 8 : i32
    %33 = arith.index_cast %32 : i32 to index
    %c0_24 = arith.constant 0 : index
    %34 = vector.load %arg9[%33, %c0_24] : memref<64x128xf32, #tpu.memory_space<vmem>>, vector<8x128xf32>
    %35 = arith.truncf %24 : vector<8x128xf32> to vector<8x128xbf16>
    %cst_25 = arith.constant dense<0.000000e+00> : vector<8x128xf32>
    %36 = tpu.matmul %35, %10, %cst_25 {dimension_numbers = #tpu.dot_dimension_numbers<[1], [0], [0], [1], [0, 0, 1, 1], [], []>} : vector<8x128xbf16>, vector<128x128xbf16>, vector<8x128xf32> -> vector<8x128xf32>
    %37 = arith.addf %36, %34 : vector<8x128xf32>
    %cst_26 = arith.constant 0.000000e+00 : f32
    %38 = vector.broadcast %cst_26 : f32 to vector<8x128xf32>
    %39 = arith.maximumf %37, %38 : vector<8x128xf32>
    %40 = arith.truncf %39 : vector<8x128xf32> to vector<8x128xbf16>
    %cst_27 = arith.constant dense<0.000000e+00> : vector<8x128xf32>
    %41 = tpu.matmul %40, %14, %cst_27 {dimension_numbers = #tpu.dot_dimension_numbers<[1], [0], [0], [1], [0, 0, 1, 1], [], []>} : vector<8x128xbf16>, vector<128x128xbf16>, vector<8x128xf32> -> vector<8x128xf32>
    %42 = vector.broadcast %12 : vector<1x128xf32> to vector<8x128xf32>
    %43 = arith.addf %41, %42 : vector<8x128xf32>
    %44 = arith.index_cast %32 : i32 to index
    %c0_28 = arith.constant 0 : index
    %45 = vector.load %arg10[%44, %c0_28] : memref<64x128xf32, #tpu.memory_space<vmem>>, vector<8x128xf32>
    tpu.vector_store %arg10[%44, %c0_28], %43 {strides = array<i32>} : memref<64x128xf32, #tpu.memory_space<vmem>>, vector<8x128xf32>,
    %c2_i32 = arith.constant 2 : i32
    %c8_i32_29 = arith.constant 8 : i32
    %46 = arith.muli %c2_i32, %c8_i32_29 : i32
    %47 = tpu.assume_multiple %46, 8 : i32
    %48 = arith.index_cast %47 : i32 to index
    %c0_30 = arith.constant 0 : index
    %49 = vector.load %arg9[%48, %c0_30] : memref<64x128xf32, #tpu.memory_space<vmem>>, vector<8x128xf32>
    %50 = arith.truncf %39 : vector<8x128xf32> to vector<8x128xbf16>
    %cst_31 = arith.constant dense<0.000000e+00> : vector<8x128xf32>
    %51 = tpu.matmul %50, %10, %cst_31 {dimension_numbers = #tpu.dot_dimension_numbers<[1], [0], [0], [1], [0, 0, 1, 1], [], []>} : vector<8x128xbf16>, vector<128x128xbf16>, vector<8x128xf32> -> vector<8x128xf32>
    %52 = arith.addf %51, %49 : vector<8x128xf32>
    %cst_32 = arith.constant 0.000000e+00 : f32
    %53 = vector.broadcast %cst_32 : f32 to vector<8x128xf32>
    %54 = arith.maximumf %52, %53 : vector<8x128xf32>
    %55 = arith.truncf %54 : vector<8x128xf32> to vector<8x128xbf16>
    %cst_33 = arith.constant dense<0.000000e+00> : vector<8x128xf32>
    %56 = tpu.matmul %55, %14, %cst_33 {dimension_numbers = #tpu.dot_dimension_numbers<[1], [0], [0], [1], [0, 0, 1, 1], [], []>} : vector<8x128xbf16>, vector<128x128xbf16>, vector<8x128xf32> -> vector<8x128xf32>
    %57 = vector.broadcast %12 : vector<1x128xf32> to vector<8x128xf32>
    %58 = arith.addf %56, %57 : vector<8x128xf32>
    %59 = arith.index_cast %47 : i32 to index
    %c0_34 = arith.constant 0 : index
    %60 = vector.load %arg10[%59, %c0_34] : memref<64x128xf32, #tpu.memory_space<vmem>>, vector<8x128xf32>
    tpu.vector_store %arg10[%59, %c0_34], %58 {strides = array<i32>} : memref<64x128xf32, #tpu.memory_space<vmem>>, vector<8x128xf32>,
    %c3_i32 = arith.constant 3 : i32
    %c8_i32_35 = arith.constant 8 : i32
    %61 = arith.muli %c3_i32, %c8_i32_35 : i32
    %62 = tpu.assume_multiple %61, 8 : i32
    %63 = arith.index_cast %62 : i32 to index
    %c0_36 = arith.constant 0 : index
    %64 = vector.load %arg9[%63, %c0_36] : memref<64x128xf32, #tpu.memory_space<vmem>>, vector<8x128xf32>
    %65 = arith.truncf %54 : vector<8x128xf32> to vector<8x128xbf16>
    %cst_37 = arith.constant dense<0.000000e+00> : vector<8x128xf32>
    %66 = tpu.matmul %65, %10, %cst_37 {dimension_numbers = #tpu.dot_dimension_numbers<[1], [0], [0], [1], [0, 0, 1, 1], [], []>} : vector<8x128xbf16>, vector<128x128xbf16>, vector<8x128xf32> -> vector<8x128xf32>
    %67 = arith.addf %66, %64 : vector<8x128xf32>
    %cst_38 = arith.constant 0.000000e+00 : f32
    %68 = vector.broadcast %cst_38 : f32 to vector<8x128xf32>
    %69 = arith.maximumf %67, %68 : vector<8x128xf32>
    %70 = arith.truncf %69 : vector<8x128xf32> to vector<8x128xbf16>
    %cst_39 = arith.constant dense<0.000000e+00> : vector<8x128xf32>
    %71 = tpu.matmul %70, %14, %cst_39 {dimension_numbers = #tpu.dot_dimension_numbers<[1], [0], [0], [1], [0, 0, 1, 1], [], []>} : vector<8x128xbf16>, vector<128x128xbf16>, vector<8x128xf32> -> vector<8x128xf32>
    %72 = vector.broadcast %12 : vector<1x128xf32> to vector<8x128xf32>
    %73 = arith.addf %71, %72 : vector<8x128xf32>
    %74 = arith.index_cast %62 : i32 to index
    %c0_40 = arith.constant 0 : index
    %75 = vector.load %arg10[%74, %c0_40] : memref<64x128xf32, #tpu.memory_space<vmem>>, vector<8x128xf32>
    tpu.vector_store %arg10[%74, %c0_40], %73 {strides = array<i32>} : memref<64x128xf32, #tpu.memory_space<vmem>>, vector<8x128xf32>,
    %c4_i32 = arith.constant 4 : i32
    %c8_i32_41 = arith.constant 8 : i32
    %76 = arith.muli %c4_i32, %c8_i32_41 : i32
    %77 = tpu.assume_multiple %76, 8 : i32
    %78 = arith.index_cast %77 : i32 to index
    %c0_42 = arith.constant 0 : index
    %79 = vector.load %arg9[%78, %c0_42] : memref<64x128xf32, #tpu.memory_space<vmem>>, vector<8x128xf32>
    %80 = arith.truncf %69 : vector<8x128xf32> to vector<8x128xbf16>
    %cst_43 = arith.constant dense<0.000000e+00> : vector<8x128xf32>
    %81 = tpu.matmul %80, %10, %cst_43 {dimension_numbers = #tpu.dot_dimension_numbers<[1], [0], [0], [1], [0, 0, 1, 1], [], []>} : vector<8x128xbf16>, vector<128x128xbf16>, vector<8x128xf32> -> vector<8x128xf32>
    %82 = arith.addf %81, %79 : vector<8x128xf32>
    %cst_44 = arith.constant 0.000000e+00 : f32
    %83 = vector.broadcast %cst_44 : f32 to vector<8x128xf32>
    %84 = arith.maximumf %82, %83 : vector<8x128xf32>
    %85 = arith.truncf %84 : vector<8x128xf32> to vector<8x128xbf16>
    %cst_45 = arith.constant dense<0.000000e+00> : vector<8x128xf32>
    %86 = tpu.matmul %85, %14, %cst_45 {dimension_numbers = #tpu.dot_dimension_numbers<[1], [0], [0], [1], [0, 0, 1, 1], [], []>} : vector<8x128xbf16>, vector<128x128xbf16>, vector<8x128xf32> -> vector<8x128xf32>
    %87 = vector.broadcast %12 : vector<1x128xf32> to vector<8x128xf32>
    %88 = arith.addf %86, %87 : vector<8x128xf32>
    %89 = arith.index_cast %77 : i32 to index
    %c0_46 = arith.constant 0 : index
    %90 = vector.load %arg10[%89, %c0_46] : memref<64x128xf32, #tpu.memory_space<vmem>>, vector<8x128xf32>
    tpu.vector_store %arg10[%89, %c0_46], %88 {strides = array<i32>} : memref<64x128xf32, #tpu.memory_space<vmem>>, vector<8x128xf32>,
    %c5_i32 = arith.constant 5 : i32
    %c8_i32_47 = arith.constant 8 : i32
    %91 = arith.muli %c5_i32, %c8_i32_47 : i32
    %92 = tpu.assume_multiple %91, 8 : i32
    %93 = arith.index_cast %92 : i32 to index
    %c0_48 = arith.constant 0 : index
    %94 = vector.load %arg9[%93, %c0_48] : memref<64x128xf32, #tpu.memory_space<vmem>>, vector<8x128xf32>
    %95 = arith.truncf %84 : vector<8x128xf32> to vector<8x128xbf16>
    %cst_49 = arith.constant dense<0.000000e+00> : vector<8x128xf32>
    %96 = tpu.matmul %95, %10, %cst_49 {dimension_numbers = #tpu.dot_dimension_numbers<[1], [0], [0], [1], [0, 0, 1, 1], [], []>} : vector<8x128xbf16>, vector<128x128xbf16>, vector<8x128xf32> -> vector<8x128xf32>
    %97 = arith.addf %96, %94 : vector<8x128xf32>
    %cst_50 = arith.constant 0.000000e+00 : f32
    %98 = vector.broadcast %cst_50 : f32 to vector<8x128xf32>
    %99 = arith.maximumf %97, %98 : vector<8x128xf32>
    %100 = arith.truncf %99 : vector<8x128xf32> to vector<8x128xbf16>
    %cst_51 = arith.constant dense<0.000000e+00> : vector<8x128xf32>
    %101 = tpu.matmul %100, %14, %cst_51 {dimension_numbers = #tpu.dot_dimension_numbers<[1], [0], [0], [1], [0, 0, 1, 1], [], []>} : vector<8x128xbf16>, vector<128x128xbf16>, vector<8x128xf32> -> vector<8x128xf32>
    %102 = vector.broadcast %12 : vector<1x128xf32> to vector<8x128xf32>
    %103 = arith.addf %101, %102 : vector<8x128xf32>
    %104 = arith.index_cast %92 : i32 to index
    %c0_52 = arith.constant 0 : index
    %105 = vector.load %arg10[%104, %c0_52] : memref<64x128xf32, #tpu.memory_space<vmem>>, vector<8x128xf32>
    tpu.vector_store %arg10[%104, %c0_52], %103 {strides = array<i32>} : memref<64x128xf32, #tpu.memory_space<vmem>>, vector<8x128xf32>,
    %c6_i32 = arith.constant 6 : i32
    %c8_i32_53 = arith.constant 8 : i32
    %106 = arith.muli %c6_i32, %c8_i32_53 : i32
    %107 = tpu.assume_multiple %106, 8 : i32
    %108 = arith.index_cast %107 : i32 to index
    %c0_54 = arith.constant 0 : index
    %109 = vector.load %arg9[%108, %c0_54] : memref<64x128xf32, #tpu.memory_space<vmem>>, vector<8x128xf32>
    %110 = arith.truncf %99 : vector<8x128xf32> to vector<8x128xbf16>
    %cst_55 = arith.constant dense<0.000000e+00> : vector<8x128xf32>
    %111 = tpu.matmul %110, %10, %cst_55 {dimension_numbers = #tpu.dot_dimension_numbers<[1], [0], [0], [1], [0, 0, 1, 1], [], []>} : vector<8x128xbf16>, vector<128x128xbf16>, vector<8x128xf32> -> vector<8x128xf32>
    %112 = arith.addf %111, %109 : vector<8x128xf32>
    %cst_56 = arith.constant 0.000000e+00 : f32
    %113 = vector.broadcast %cst_56 : f32 to vector<8x128xf32>
    %114 = arith.maximumf %112, %113 : vector<8x128xf32>
    %115 = arith.truncf %114 : vector<8x128xf32> to vector<8x128xbf16>
    %cst_57 = arith.constant dense<0.000000e+00> : vector<8x128xf32>
    %116 = tpu.matmul %115, %14, %cst_57 {dimension_numbers = #tpu.dot_dimension_numbers<[1], [0], [0], [1], [0, 0, 1, 1], [], []>} : vector<8x128xbf16>, vector<128x128xbf16>, vector<8x128xf32> -> vector<8x128xf32>
    %117 = vector.broadcast %12 : vector<1x128xf32> to vector<8x128xf32>
    %118 = arith.addf %116, %117 : vector<8x128xf32>
    %119 = arith.index_cast %107 : i32 to index
    %c0_58 = arith.constant 0 : index
    %120 = vector.load %arg10[%119, %c0_58] : memref<64x128xf32, #tpu.memory_space<vmem>>, vector<8x128xf32>
    tpu.vector_store %arg10[%119, %c0_58], %118 {strides = array<i32>} : memref<64x128xf32, #tpu.memory_space<vmem>>, vector<8x128xf32>,
    %c7_i32 = arith.constant 7 : i32
    %c8_i32_59 = arith.constant 8 : i32
    %121 = arith.muli %c7_i32, %c8_i32_59 : i32
    %122 = tpu.assume_multiple %121, 8 : i32
    %123 = arith.index_cast %122 : i32 to index
    %c0_60 = arith.constant 0 : index
    %124 = vector.load %arg9[%123, %c0_60] : memref<64x128xf32, #tpu.memory_space<vmem>>, vector<8x128xf32>
    %125 = arith.truncf %114 : vector<8x128xf32> to vector<8x128xbf16>
    %cst_61 = arith.constant dense<0.000000e+00> : vector<8x128xf32>
    %126 = tpu.matmul %125, %10, %cst_61 {dimension_numbers = #tpu.dot_dimension_numbers<[1], [0], [0], [1], [0, 0, 1, 1], [], []>} : vector<8x128xbf16>, vector<128x128xbf16>, vector<8x128xf32> -> vector<8x128xf32>
    %127 = arith.addf %126, %124 : vector<8x128xf32>
    %cst_62 = arith.constant 0.000000e+00 : f32
    %128 = vector.broadcast %cst_62 : f32 to vector<8x128xf32>
    %129 = arith.maximumf %127, %128 : vector<8x128xf32>
    %130 = arith.truncf %129 : vector<8x128xf32> to vector<8x128xbf16>
    %cst_63 = arith.constant dense<0.000000e+00> : vector<8x128xf32>
    %131 = tpu.matmul %130, %14, %cst_63 {dimension_numbers = #tpu.dot_dimension_numbers<[1], [0], [0], [1], [0, 0, 1, 1], [], []>} : vector<8x128xbf16>, vector<128x128xbf16>, vector<8x128xf32> -> vector<8x128xf32>
    %132 = vector.broadcast %12 : vector<1x128xf32> to vector<8x128xf32>
    %133 = arith.addf %131, %132 : vector<8x128xf32>
    %134 = arith.index_cast %122 : i32 to index
    %c0_64 = arith.constant 0 : index
    %135 = vector.load %arg10[%134, %c0_64] : memref<64x128xf32, #tpu.memory_space<vmem>>, vector<8x128xf32>
    tpu.vector_store %arg10[%134, %c0_64], %133 {strides = array<i32>} : memref<64x128xf32, #tpu.memory_space<vmem>>, vector<8x128xf32>,
    %c8_i32_65 = arith.constant 8 : i32
    %c1_66 = arith.constant 1 : index
    %c0_67 = arith.constant 0 : index
    %c0_68 = arith.constant 0 : index
    %136 = vector.load %arg4[%c1_66, %c0_67, %c0_68] : memref<2x128x128xbf16, #tpu.memory_space<vmem>>, vector<1x128x128xbf16>
    %137 = vector.shape_cast %136 : vector<1x128x128xbf16> to vector<128x128xbf16>
    %cst_69 = arith.constant 0.000000e+00 : f32
    %138 = vector.broadcast %cst_69 : f32 to vector<8x128xf32>
    %c0_i32_70 = arith.constant 0 : i32
    %c8_i32_71 = arith.constant 8 : i32
    %139 = arith.muli %c0_i32_70, %c8_i32_71 : i32
    %140 = tpu.assume_multiple %139, 8 : i32
    %141 = arith.index_cast %140 : i32 to index
    %c0_72 = arith.constant 0 : index
    %142 = vector.load %arg10[%141, %c0_72] : memref<64x128xf32, #tpu.memory_space<vmem>>, vector<8x128xf32>
    %143 = arith.truncf %138 : vector<8x128xf32> to vector<8x128xbf16>
    %cst_73 = arith.constant dense<0.000000e+00> : vector<8x128xf32>
    %144 = tpu.matmul %143, %137, %cst_73 {dimension_numbers = #tpu.dot_dimension_numbers<[1], [0], [0], [1], [0, 0, 1, 1], [], []>} : vector<8x128xbf16>, vector<128x128xbf16>, vector<8x128xf32> -> vector<8x128xf32>
    %145 = arith.addf %144, %142 : vector<8x128xf32>
    %cst_74 = arith.constant 0.000000e+00 : f32
    %146 = vector.broadcast %cst_74 : f32 to vector<8x128xf32>
    %147 = arith.maximumf %145, %146 : vector<8x128xf32>
    %c1_i32_75 = arith.constant 1 : i32
    %c8_i32_76 = arith.constant 8 : i32
    %148 = arith.muli %c1_i32_75, %c8_i32_76 : i32
    %149 = tpu.assume_multiple %148, 8 : i32
    %150 = arith.index_cast %149 : i32 to index
    %c0_77 = arith.constant 0 : index
    %151 = vector.load %arg10[%150, %c0_77] : memref<64x128xf32, #tpu.memory_space<vmem>>, vector<8x128xf32>
    %152 = arith.truncf %147 : vector<8x128xf32> to vector<8x128xbf16>
    %cst_78 = arith.constant dense<0.000000e+00> : vector<8x128xf32>
    %153 = tpu.matmul %152, %137, %cst_78 {dimension_numbers = #tpu.dot_dimension_numbers<[1], [0], [0], [1], [0, 0, 1, 1], [], []>} : vector<8x128xbf16>, vector<128x128xbf16>, vector<8x128xf32> -> vector<8x128xf32>
    %154 = arith.addf %153, %151 : vector<8x128xf32>
    %cst_79 = arith.constant 0.000000e+00 : f32
    %155 = vector.broadcast %cst_79 : f32 to vector<8x128xf32>
    %156 = arith.maximumf %154, %155 : vector<8x128xf32>
    %c2_i32_80 = arith.constant 2 : i32
    %c8_i32_81 = arith.constant 8 : i32
    %157 = arith.muli %c2_i32_80, %c8_i32_81 : i32
    %158 = tpu.assume_multiple %157, 8 : i32
    %159 = arith.index_cast %158 : i32 to index
    %c0_82 = arith.constant 0 : index
    %160 = vector.load %arg10[%159, %c0_82] : memref<64x128xf32, #tpu.memory_space<vmem>>, vector<8x128xf32>
    %161 = arith.truncf %156 : vector<8x128xf32> to vector<8x128xbf16>
    %cst_83 = arith.constant dense<0.000000e+00> : vector<8x128xf32>
    %162 = tpu.matmul %161, %137, %cst_83 {dimension_numbers = #tpu.dot_dimension_numbers<[1], [0], [0], [1], [0, 0, 1, 1], [], []>} : vector<8x128xbf16>, vector<128x128xbf16>, vector<8x128xf32> -> vector<8x128xf32>
    %163 = arith.addf %162, %160 : vector<8x128xf32>
    %cst_84 = arith.constant 0.000000e+00 : f32
    %164 = vector.broadcast %cst_84 : f32 to vector<8x128xf32>
    %165 = arith.maximumf %163, %164 : vector<8x128xf32>
    %c3_i32_85 = arith.constant 3 : i32
    %c8_i32_86 = arith.constant 8 : i32
    %166 = arith.muli %c3_i32_85, %c8_i32_86 : i32
    %167 = tpu.assume_multiple %166, 8 : i32
    %168 = arith.index_cast %167 : i32 to index
    %c0_87 = arith.constant 0 : index
    %169 = vector.load %arg10[%168, %c0_87] : memref<64x128xf32, #tpu.memory_space<vmem>>, vector<8x128xf32>
    %170 = arith.truncf %165 : vector<8x128xf32> to vector<8x128xbf16>
    %cst_88 = arith.constant dense<0.000000e+00> : vector<8x128xf32>
    %171 = tpu.matmul %170, %137, %cst_88 {dimension_numbers = #tpu.dot_dimension_numbers<[1], [0], [0], [1], [0, 0, 1, 1], [], []>} : vector<8x128xbf16>, vector<128x128xbf16>, vector<8x128xf32> -> vector<8x128xf32>
    %172 = arith.addf %171, %169 : vector<8x128xf32>
    %cst_89 = arith.constant 0.000000e+00 : f32
    %173 = vector.broadcast %cst_89 : f32 to vector<8x128xf32>
    %174 = arith.maximumf %172, %173 : vector<8x128xf32>
    %c4_i32_90 = arith.constant 4 : i32
    %c8_i32_91 = arith.constant 8 : i32
    %175 = arith.muli %c4_i32_90, %c8_i32_91 : i32
    %176 = tpu.assume_multiple %175, 8 : i32
    %177 = arith.index_cast %176 : i32 to index
    %c0_92 = arith.constant 0 : index
    %178 = vector.load %arg10[%177, %c0_92] : memref<64x128xf32, #tpu.memory_space<vmem>>, vector<8x128xf32>
    %179 = arith.truncf %174 : vector<8x128xf32> to vector<8x128xbf16>
    %cst_93 = arith.constant dense<0.000000e+00> : vector<8x128xf32>
    %180 = tpu.matmul %179, %137, %cst_93 {dimension_numbers = #tpu.dot_dimension_numbers<[1], [0], [0], [1], [0, 0, 1, 1], [], []>} : vector<8x128xbf16>, vector<128x128xbf16>, vector<8x128xf32> -> vector<8x128xf32>
    %181 = arith.addf %180, %178 : vector<8x128xf32>
    %cst_94 = arith.constant 0.000000e+00 : f32
    %182 = vector.broadcast %cst_94 : f32 to vector<8x128xf32>
    %183 = arith.maximumf %181, %182 : vector<8x128xf32>
    %c5_i32_95 = arith.constant 5 : i32
    %c8_i32_96 = arith.constant 8 : i32
    %184 = arith.muli %c5_i32_95, %c8_i32_96 : i32
    %185 = tpu.assume_multiple %184, 8 : i32
    %186 = arith.index_cast %185 : i32 to index
    %c0_97 = arith.constant 0 : index
    %187 = vector.load %arg10[%186, %c0_97] : memref<64x128xf32, #tpu.memory_space<vmem>>, vector<8x128xf32>
    %188 = arith.truncf %183 : vector<8x128xf32> to vector<8x128xbf16>
    %cst_98 = arith.constant dense<0.000000e+00> : vector<8x128xf32>
    %189 = tpu.matmul %188, %137, %cst_98 {dimension_numbers = #tpu.dot_dimension_numbers<[1], [0], [0], [1], [0, 0, 1, 1], [], []>} : vector<8x128xbf16>, vector<128x128xbf16>, vector<8x128xf32> -> vector<8x128xf32>
    %190 = arith.addf %189, %187 : vector<8x128xf32>
    %cst_99 = arith.constant 0.000000e+00 : f32
    %191 = vector.broadcast %cst_99 : f32 to vector<8x128xf32>
    %192 = arith.maximumf %190, %191 : vector<8x128xf32>
    %c6_i32_100 = arith.constant 6 : i32
    %c8_i32_101 = arith.constant 8 : i32
    %193 = arith.muli %c6_i32_100, %c8_i32_101 : i32
    %194 = tpu.assume_multiple %193, 8 : i32
    %195 = arith.index_cast %194 : i32 to index
    %c0_102 = arith.constant 0 : index
    %196 = vector.load %arg10[%195, %c0_102] : memref<64x128xf32, #tpu.memory_space<vmem>>, vector<8x128xf32>
    %197 = arith.truncf %192 : vector<8x128xf32> to vector<8x128xbf16>
    %cst_103 = arith.constant dense<0.000000e+00> : vector<8x128xf32>
    %198 = tpu.matmul %197, %137, %cst_103 {dimension_numbers = #tpu.dot_dimension_numbers<[1], [0], [0], [1], [0, 0, 1, 1], [], []>} : vector<8x128xbf16>, vector<128x128xbf16>, vector<8x128xf32> -> vector<8x128xf32>
    %199 = arith.addf %198, %196 : vector<8x128xf32>
    %cst_104 = arith.constant 0.000000e+00 : f32
    %200 = vector.broadcast %cst_104 : f32 to vector<8x128xf32>
    %201 = arith.maximumf %199, %200 : vector<8x128xf32>
    %c7_i32_105 = arith.constant 7 : i32
    %c8_i32_106 = arith.constant 8 : i32
    %202 = arith.muli %c7_i32_105, %c8_i32_106 : i32
    %203 = tpu.assume_multiple %202, 8 : i32
    %204 = arith.index_cast %203 : i32 to index
    %c0_107 = arith.constant 0 : index
    %205 = vector.load %arg10[%204, %c0_107] : memref<64x128xf32, #tpu.memory_space<vmem>>, vector<8x128xf32>
    %206 = arith.truncf %201 : vector<8x128xf32> to vector<8x128xbf16>
    %cst_108 = arith.constant dense<0.000000e+00> : vector<8x128xf32>
    %207 = tpu.matmul %206, %137, %cst_108 {dimension_numbers = #tpu.dot_dimension_numbers<[1], [0], [0], [1], [0, 0, 1, 1], [], []>} : vector<8x128xbf16>, vector<128x128xbf16>, vector<8x128xf32> -> vector<8x128xf32>
    %208 = arith.addf %207, %205 : vector<8x128xf32>
    %cst_109 = arith.constant 0.000000e+00 : f32
    %209 = vector.broadcast %cst_109 : f32 to vector<8x128xf32>
    %210 = arith.maximumf %208, %209 : vector<8x128xf32>
    %c8_i32_110 = arith.constant 8 : i32
    %211 = arith.truncf %210 : vector<8x128xf32> to vector<8x128xbf16>
    %c0_111 = arith.constant 0 : index
    %c0_112 = arith.constant 0 : index
    %212 = vector.load %arg6[%c0_111, %c0_112] : memref<128x128xbf16, #tpu.memory_space<vmem>>, vector<128x128xbf16>
    %cst_113 = arith.constant dense<0.000000e+00> : vector<8x128xf32>
    %213 = tpu.matmul %211, %212, %cst_113 {dimension_numbers = #tpu.dot_dimension_numbers<[1], [0], [0], [1], [0, 0, 1, 1], [], []>} : vector<8x128xbf16>, vector<128x128xbf16>, vector<8x128xf32> -> vector<8x128xf32>
    %c0_114 = arith.constant 0 : index
    %c0_115 = arith.constant 0 : index
    %214 = vector.load %arg7[%c0_114, %c0_115] : memref<1x128xf32, #tpu.memory_space<vmem>>, vector<1x128xf32>
    %215 = vector.broadcast %214 : vector<1x128xf32> to vector<8x128xf32>
    %216 = arith.addf %213, %215 : vector<8x128xf32>
    %c0_116 = arith.constant 0 : index
    %c0_117 = arith.constant 0 : index
    %c0_118 = arith.constant 0 : index
    %217 = vector.load %arg8[%c0_116, %c0_117, %c0_118] : memref<1x8x128xf32, #tpu.memory_space<vmem>>, vector<1x8x128xf32>
    %218 = vector.shape_cast %217 : vector<1x8x128xf32> to vector<8x128xf32>
    %219 = vector.shape_cast %216 : vector<8x128xf32> to vector<1x8x128xf32>
    tpu.vector_store %arg8[%c0_116, %c0_117, %c0_118], %219 {strides = array<i32>} : memref<1x8x128xf32, #tpu.memory_space<vmem>>, vector<1x8x128xf32>,
    return
  }
  func.func @transform_0(%arg0: i32) -> (i32, i32, i32) {
    %c0_i32 = arith.constant 0 : i32
    %c0_i32_0 = arith.constant 0 : i32
    %c0_i32_1 = arith.constant 0 : i32
    return %arg0, %c0_i32, %c0_i32_0 : i32, i32, i32
  }
  func.func @transform_1(%arg0: i32) -> (i32, i32) {
    %c0_i32 = arith.constant 0 : i32
    %c0_i32_0 = arith.constant 0 : i32
    %c0_i32_1 = arith.constant 0 : i32
    return %c0_i32, %c0_i32_0 : i32, i32
  }
  func.func @transform_2(%arg0: i32) -> (i32, i32, i32) {
    %c0_i32 = arith.constant 0 : i32
    %c0_i32_0 = arith.constant 0 : i32
    %c0_i32_1 = arith.constant 0 : i32
    %c0_i32_2 = arith.constant 0 : i32
    return %c0_i32, %c0_i32_0, %c0_i32_1 : i32, i32, i32
  }
  func.func @transform_3(%arg0: i32) -> (i32, i32, i32) {
    %c0_i32 = arith.constant 0 : i32
    %c0_i32_0 = arith.constant 0 : i32
    %c0_i32_1 = arith.constant 0 : i32
    %c0_i32_2 = arith.constant 0 : i32
    return %c0_i32, %c0_i32_0, %c0_i32_1 : i32, i32, i32
  }
  func.func @transform_4(%arg0: i32) -> (i32, i32, i32) {
    %c0_i32 = arith.constant 0 : i32
    %c0_i32_0 = arith.constant 0 : i32
    %c0_i32_1 = arith.constant 0 : i32
    %c0_i32_2 = arith.constant 0 : i32
    return %c0_i32, %c0_i32_0, %c0_i32_1 : i32, i32, i32
  }
  func.func @transform_5(%arg0: i32) -> (i32, i32) {
    %c0_i32 = arith.constant 0 : i32
    %c0_i32_0 = arith.constant 0 : i32
    %c0_i32_1 = arith.constant 0 : i32
    return %c0_i32, %c0_i32_0 : i32, i32
  }
  func.func @transform_6(%arg0: i32) -> (i32, i32) {
    %c0_i32 = arith.constant 0 : i32
    %c0_i32_0 = arith.constant 0 : i32
    %c0_i32_1 = arith.constant 0 : i32
    return %c0_i32, %c0_i32_0 : i32, i32
  }
  func.func @transform_7(%arg0: i32) -> (i32, i32, i32) {
    %c0_i32 = arith.constant 0 : i32
    %c0_i32_0 = arith.constant 0 : i32
    %c0_i32_1 = arith.constant 0 : i32
    return %arg0, %c0_i32, %c0_i32_0 : i32, i32, i32
  }
}

</mosaic_0001>

<bundles_post_ra>
// kernel: tpu_custom_call.1
= control target key start
LH: loop header
LB: loop body
LE: loop exit
PB: predicated region body
PF: predicated region fallthrough
CT: control target
= control target key end

     0   :  { %12 = vsyncpa [#allocation5], 0  ;;  %s3117_s0 = inlined_call_operand.vmem [shape: bf16[1,64,16], index: 0, kind: input, shape index: {}]   ;;  %s3118_s1 = inlined_call_operand.vmem [shape: bf16[16,128], index: 1, kind: input, shape index: {}]   ;;  %s3119_s2 = inlined_call_operand.hbm [shape: bf16[1,128,128], index: 2, kind: input, shape index: {}]   ;;  %s3120_s3 = inlined_call_operand.hbm [shape: bf16[2,128,128], index: 3, kind: input, shape index: {}]   ;;  %s3121_s4 = inlined_call_operand.vmem [shape: f32[2,1,128], index: 4, kind: input, shape index: {}]   ;;  %s3122_s5 = inlined_call_operand.hbm [shape: bf16[128,128], index: 5, kind: input, shape index: {}]   ;;  %s3123_s6 = inlined_call_operand.vmem [shape: f32[1,128], index: 6, kind: input, shape index: {}]   ;;  %s3124_s7 = inlined_call_operand.hbm [shape: f32[1,8,128], index: 7, kind: output, shape index: {}]  }
   0x1   :  { %13 = vsyncpa [#allocation8], 0 }
   0x2   :  { %14 = vsyncpa [#allocation6], 0  ;;  %s2474_s24 = smov [#allocation7]   ;;  %s2475_s26 = smov [#allocation4]  }
   0x3   :  { %s36_s25 = sshll.u32 %s2474_s24, 4  ;;  %s24_s27 = sshll.u32 %s2475_s26, 4  ;;  %s37_s25 = int_to_ptr.vmem [resolvable:$true] %s36_s25  ;;  %s25_s27 = int_to_ptr.vmem [resolvable:$true] %s24_s27 }
   0x4   :  { %s2396_s28 = scalar_lea.vmem %s37_s25, 2048  ;;  %p2401_p1 = scmp.lt.s32.totalorder %s37_s25, %s37_s25 }
   0x5   :  { %p2397_p0 = scmp.ne.s32.totalorder %s37_s25, %s2396_s28  ;;  %p2402_p2 = scmp.lt.s32.totalorder %s2396_s28, %s2396_s28 }
   0x7   :  { %p2403_p3 = por %p2402_p2, %p2401_p1 }
   0x9   :  { %p2404_p4 = pnand %p2403_p3, %p2397_p0 }
   0xb   :  { %2407 = shalt.err (!%p2404_p4)
}
   0xc   :  { %s2476_s29 = smov 64   ;;  %s2477_s30 = smov 4  }
   0xd   :  { %42 = dma.hbm_to_vmem [thread:$0]  %s3120_s3, 2048, %s37_s25, [#allocation8], %s2476_s29, %s2476_s29, %s2477_s30  }
   0xe   :  { %s2416_s10 = scalar_lea.vmem %s25_s27, 1024  ;;  %p2421_p6 = scmp.lt.s32.totalorder %s25_s27, %s25_s27 }
   0xf   :  { %p2417_p5 = scmp.ne.s32.totalorder %s25_s27, %s2416_s10  ;;  %p2422_p7 = scmp.lt.s32.totalorder %s2416_s10, %s2416_s10 }
  0x11   :  { %p2423_p8 = por %p2422_p7, %p2421_p6 }
  0x13   :  { %p2424_p9 = pnand %p2423_p8, %p2417_p5 }
  0x15   :  { %2427 = shalt.err (!%p2424_p9)
}
  0x16   :  { %30 = dma.hbm_to_vmem [thread:$0]  %s3119_s2, 1024, %s25_s27, [#allocation5], %s2476_s29, %s2476_s29, %s2477_s30  }
  0x17   :  { %s2478_s13 = smov [#allocation9]  }
  0x18   :  { %s50_s14 = sshll.u32 %s2478_s13, 4  ;;  %s51_s14 = int_to_ptr.vmem [resolvable:$true] %s50_s14 }
  0x19   :  { %s2436_s15 = scalar_lea.vmem %s51_s14, 1024  ;;  %p2441_p11 = scmp.lt.s32.totalorder %s51_s14, %s51_s14 }
  0x1a   :  { %p2437_p10 = scmp.ne.s32.totalorder %s51_s14, %s2436_s15  ;;  %p2442_p12 = scmp.lt.s32.totalorder %s2436_s15, %s2436_s15 }
  0x1c   :  { %p2443_p13 = por %p2442_p12, %p2441_p11 }
  0x1e   :  { %p2444_p0 = pnand %p2443_p13, %p2437_p10 }
  0x20   :  { %2447 = shalt.err (!%p2444_p0)
}
  0x21   :  { %56 = dma.hbm_to_vmem [thread:$0]  %s3122_s5, 1024, %s51_s14, [#allocation8], %s2476_s29, %s2476_s29, %s2477_s30  }
  0x22   :  { %2468 = dma.done.wait [#allocation5], 1024  }
  0x23   :  { %2469 = vsyncadd [#allocation5], 4294966272 }
  0x24   :  { %2470 = dma.done.wait [#allocation8], 3072  }
  0x25   :  { %2471 = vsyncadd [#allocation8], 4294964224  ;;  %v2479_v0 = vmov 0.0   ;;  %vm2480_vm0 = vmmov 0   ;;  %v2535_v1 = vld [vmem:[#allocation7 + $0x38] sm:$0xff]   ;;  %v2538_v2 = vld [vmem:[#allocation7 + $0x30] sm:$0xff]  }
  0x26   :  { %1842 = vmatprep.subr.bf16.mxu1 %v2479_v0  ;;  %1858 = vmatprep.mubr.msk.bf16.mxu1 %vm2480_vm0, %v2479_v0  ;;  %v2541_v3 = vld [vmem:[#allocation7 + $0x28] sm:$0xff]   ;;  %v2356_v4 = vld [vmem:[%s3118_s1] sm:$0xff]   ;;  %vm112_vm1 = vcmask 130048   ;;  %v2561_v8 = vld [vmem:[#allocation4 + $0x38] sm:$0xff]   ;;  %v2481_v16 = vmov 0   ;;  %s2482_s28 = smov [#allocation10]  }
  0x27   :  { %1843 = vmatpush3.bf16.msra.mxu1 %v2535_v1  ;;  %v2357_v5 = vld [vmem:[%s3117_s0] sm:$0xff]   ;;  %1832 = vmatprep.subr.bf16.mxu0 %v2356_v4  ;;  %v2359_v6 = vld [vmem:[%s3117_s0 + $0x8] sm:$0xff]   ;;  %v2564_v9 = vld [vmem:[#allocation4 + $0x30] sm:$0xff]   ;;  %s1547_s29 = sshll.u32 %s2482_s28, 4  ;;  %s1548_s29 = int_to_ptr.vmem [resolvable:$true] %s1547_s29 }
  0x28   :  { %1844 = vmatprep.subr.bf16.mxu1 %v2479_v0  ;;  %1833 = vmatpush3.bf16.msra.mxu0 %v2356_v4  ;;  %v2557_v7 = vld [vmem:[#allocation7 + $0x20] sm:$0xff]   ;;  %v2567_v10 = vld [vmem:[#allocation7 + $0x18] sm:$0xff]   ;;  %v2571_v11 = vld [vmem:[#allocation4 + $0x28] sm:$0xff]   ;;  %s2448_s30 = scalar_lea.vmem %s1548_s29, 128  ;;  %p2453_p2 = scmp.lt.s32.totalorder %s1548_s29, %s1548_s29 }
  0x29   :  { %1834 = vmatprep.mubr.msk.bf16.mxu0 %vm112_vm1, %v2357_v5  ;;  %1862 = vmatprep.subr.bf16.mxu0 %v2479_v0  ;;  %v2573_v12 = vld [vmem:[#allocation7 + $0x10] sm:$0xff]   ;;  %v2579_v13 = vld [vmem:[#allocation4 + $0x20] sm:$0xff]   ;;  %v2581_v14 = vld [vmem:[#allocation7 + $0x8] sm:$0xff]   ;;  %p2449_p1 = scmp.ne.s32.totalorder %s1548_s29, %s2448_s30  ;;  %p2454_p3 = scmp.lt.s32.totalorder %s2448_s30, %s2448_s30 }
  0x2a   :  { %v2587_v15 = vld [vmem:[#allocation7] sm:$0xff]   ;;  %v2614_v17 = vld [vmem:[#allocation4 + $0x18] sm:$0xff]   ;;  %v2618_v18 = vld [vmem:[#allocation4 + $0x10] sm:$0xff]  }
  0x2b   :  { %1845 = vmatpush3.bf16.msra.mxu1 %v2538_v2  ;;  %1835 = vmatmul.mubr.msk.bf16.vlgmr.msra.gmra.mxu0 %vm112_vm1, %v2359_v6  ;;  %v2368_v19 = vld [vmem:[%s3117_s0 + $0x10] sm:$0xff]   ;;  %v2369_v20 = vld [vmem:[%s3117_s0 + $0x18] sm:$0xff]   ;;  %v2632_v21 = vld [vmem:[#allocation4 + $0x8] sm:$0xff]   ;;  %p2455_p4 = por %p2454_p3, %p2453_p2 }
  0x2c   :  { %1846 = vmatprep.subr.bf16.mxu1 %v2479_v0  ;;  %1863 = vmatpush3.bf16.msra.mxu0 %v2561_v8  ;;  %v2636_v22 = vld [vmem:[#allocation4] sm:$0xff]  }
  0x2d   :  { %1864 = vmatprep.subr.bf16.mxu0 %v2479_v0  ;;  %1838 = vmatprep.mubr.msk.bf16.mxu0 %vm112_vm1, %v2368_v19  ;;  %v2645_v24 = vld [vmem:[%s3121_s4] ss:$0 sm:$0xff]  ;;  %p2456_p5 = pnand %p2455_p4, %p2449_p1 }
  0x2f   :  { %1847 = vmatpush3.bf16.msra.mxu1 %v2541_v3 }
  0x30   :  { %1848 = vmatprep.subr.bf16.mxu1 %v2479_v0  ;;  %1865 = vmatpush3.bf16.msra.mxu0 %v2564_v9 }
  0x31   :  { %1866 = vmatprep.subr.bf16.mxu0 %v2479_v0 }
  0x33   :  { %1849 = vmatpush3.bf16.msra.mxu1 %v2557_v7  ;;  %1839 = vmatmul.mubr.msk.bf16.gmra.mxu0 %vm112_vm1, %v2369_v20 }
  0x34   :  { %1850 = vmatprep.subr.bf16.mxu1 %v2479_v0  ;;  %1867 = vmatpush3.bf16.msra.mxu0 %v2571_v11 }
  0x35   :  { %1868 = vmatprep.subr.bf16.mxu0 %v2479_v0  ;;  %1878 = vmatprep.mubr.msk.bf16.mxu0 %vm2480_vm0, %v2479_v0 }
  0x37   :  { %1851 = vmatpush3.bf16.msra.mxu1 %v2567_v10 }
  0x38   :  { %1852 = vmatprep.subr.bf16.mxu1 %v2479_v0  ;;  %1869 = vmatpush3.bf16.msra.mxu0 %v2579_v13 }
  0x39   :  { %1870 = vmatprep.subr.bf16.mxu0 %v2479_v0 }
  0x3b   :  { %1853 = vmatpush3.bf16.msra.mxu1 %v2573_v12 }
  0x3c   :  { %1854 = vmatprep.subr.bf16.mxu1 %v2479_v0  ;;  %1871 = vmatpush3.bf16.msra.mxu0 %v2614_v17 }
  0x3d   :  { %1872 = vmatprep.subr.bf16.mxu0 %v2479_v0 }
  0x3f   :  { %1855 = vmatpush3.bf16.msra.mxu1 %v2581_v14 }
  0x40   :  { %1856 = vmatprep.subr.bf16.mxu1 %v2479_v0  ;;  %1873 = vmatpush3.bf16.msra.mxu0 %v2618_v18 }
  0x41   :  { %1874 = vmatprep.subr.bf16.mxu0 %v2479_v0 }
  0x43   :  { %1857 = vmatpush3.bf16.msra.mxu1 %v2587_v15 }
  0x44   :  { %1882 = vmatprep.subr.bf16.mxu1 %v2479_v0  ;;  %1875 = vmatpush3.bf16.msra.mxu0 %v2632_v21 }
  0x45   :  { %1876 = vmatprep.subr.bf16.mxu0 %v2479_v0 }
  0x46   :  { %1859 = vmatmul.mubr.bf16.vlgmr.msra.gmra.mxu1 %v2481_v16 }
  0x47   :  { %1883 = vmatpush3.bf16.msra.mxu1 %v2535_v1  ;;  %1898 = vmatprep.mubr.msk.bf16.mxu1 %vm2480_vm0, %v2479_v0 }
  0x48   :  { %1884 = vmatprep.subr.bf16.mxu1 %v2479_v0  ;;  %1877 = vmatpush3.bf16.msra.mxu0 %v2636_v22 }
  0x49   :  { %1902 = vmatprep.subr.bf16.mxu0 %v2479_v0 }
  0x4b   :  { %1885 = vmatpush3.bf16.msra.mxu1 %v2538_v2 }
  0x4c   :  { %1886 = vmatprep.subr.bf16.mxu1 %v2479_v0 }
  0x4f   :  { %1887 = vmatpush3.bf16.msra.mxu1 %v2541_v3 }
  0x50   :  { %1888 = vmatprep.subr.bf16.mxu1 %v2479_v0 }
  0x53   :  { %1889 = vmatpush3.bf16.msra.mxu1 %v2557_v7 }
  0x54   :  { %1890 = vmatprep.subr.bf16.mxu1 %v2479_v0 }
  0x57   :  { %1891 = vmatpush3.bf16.msra.mxu1 %v2567_v10 }
  0x58   :  { %1892 = vmatprep.subr.bf16.mxu1 %v2479_v0 }
  0x5b   :  { %1893 = vmatpush3.bf16.msra.mxu1 %v2573_v12 }
  0x5c   :  { %1894 = vmatprep.subr.bf16.mxu1 %v2479_v0 }
  0x5f   :  { %1895 = vmatpush3.bf16.msra.mxu1 %v2581_v14 }
  0x60   :  { %1896 = vmatprep.subr.bf16.mxu1 %v2479_v0 }
  0x63   :  { %1897 = vmatpush3.bf16.msra.mxu1 %v2587_v15 }
  0x64   :  { %1922 = vmatprep.subr.bf16.mxu1 %v2479_v0 }
  0xeb   :  { %v2640_v23 = vpop.f32.mrf.mxu0 }
  0xec   :  { %v168_v52 = vadd.f32 %v2640_v23, %v2645_v24 }
  0xed   :  { %v159_v25 = vpop.f32.mrf.mxu0 }
  0xee   :  { %v160_v26 = vadd.f32 %v2645_v24, %v159_v25 }
  0xef   :  { %v2684_v34 = vpop.f32.mrf.mxu0 }
  0xf0   :  { %v171_v4 = vadd.f32 %v2684_v34, %v2645_v24 }
  0xf1   :  { %v162_v35 = vpop.f32.mrf.mxu0 }
  0xf2   :  { %v163_v40 = vadd.f32 %v2645_v24, %v162_v35 }
  0xf3   :  { %v2686_v36 = vpop.f32.mrf.mxu0 }
  0xf5   :  { %v2688_v37 = vpop.f32.mrf.mxu0 }
  0xf7   :  { %v2690_v38 = vpop.f32.mrf.mxu0 }
  0xf9   :  { %v2692_v39 = vpop.f32.mrf.mxu0 }
 0x106   :  { %v315_v27 = vpop.f32.mrf.mxu1 }
 0x107   :  { %v316_v28 = vadd.f32 %v315_v27, %v160_v26 }
 0x108   :  { %v1860_v29 = vpop.f32.mrf.mxu1 }
 0x109   :  { %v321_v30 = vmax.f32 %v316_v28, 0.0 }
 0x10a   :  { %v318_v31 = vpop.f32.mrf.mxu1 }
 0x10b   :  { %v322_v32 = vpack.c.bf16 %v321_v30, %v321_v30  ;;  %v176_v31 = vadd.f32 %v2645_v24, %v2688_v37  ;;  %v179_v37 = vadd.f32 %v2645_v24, %v2692_v39 }
 0x10c   :  { %v1861_v33 = vpop.f32.mrf.mxu1 }
 0x10d   :  { %1879 = vmatmul.mubr.bf16.vlgmr.msra.gmra.mxu0 %v322_v32  ;;  %1899 = vmatmul.mubr.bf16.vlgmr.msra.gmra.mxu1 %v322_v32 }
 0x10e   :  { %1903 = vmatpush3.bf16.msra.mxu0 %v2561_v8  ;;  %1923 = vmatpush3.bf16.msra.mxu1 %v2535_v1 }
 0x10f   :  { %1904 = vmatprep.subr.bf16.mxu0 %v2479_v0  ;;  %1924 = vmatprep.subr.bf16.mxu1 %v2479_v0 }
 0x110   :  { %1918 = vmatprep.mubr.msk.bf16.mxu0 %vm2480_vm0, %v2479_v0  ;;  %1938 = vmatprep.mubr.msk.bf16.mxu1 %vm2480_vm0, %v2479_v0 }
 0x112   :  { %1905 = vmatpush3.bf16.msra.mxu0 %v2564_v9  ;;  %1925 = vmatpush3.bf16.msra.mxu1 %v2538_v2 }
 0x113   :  { %1906 = vmatprep.subr.bf16.mxu0 %v2479_v0  ;;  %1926 = vmatprep.subr.bf16.mxu1 %v2479_v0 }
 0x116   :  { %1907 = vmatpush3.bf16.msra.mxu0 %v2571_v11  ;;  %1927 = vmatpush3.bf16.msra.mxu1 %v2541_v3 }
 0x117   :  { %1908 = vmatprep.subr.bf16.mxu0 %v2479_v0  ;;  %1928 = vmatprep.subr.bf16.mxu1 %v2479_v0 }
 0x11a   :  { %1909 = vmatpush3.bf16.msra.mxu0 %v2579_v13  ;;  %1929 = vmatpush3.bf16.msra.mxu1 %v2557_v7 }
 0x11b   :  { %1910 = vmatprep.subr.bf16.mxu0 %v2479_v0  ;;  %1930 = vmatprep.subr.bf16.mxu1 %v2479_v0 }
 0x11e   :  { %1911 = vmatpush3.bf16.msra.mxu0 %v2614_v17  ;;  %1931 = vmatpush3.bf16.msra.mxu1 %v2567_v10 }
 0x11f   :  { %1912 = vmatprep.subr.bf16.mxu0 %v2479_v0  ;;  %1932 = vmatprep.subr.bf16.mxu1 %v2479_v0 }
 0x122   :  { %1913 = vmatpush3.bf16.msra.mxu0 %v2618_v18  ;;  %1933 = vmatpush3.bf16.msra.mxu1 %v2573_v12 }
 0x123   :  { %1914 = vmatprep.subr.bf16.mxu0 %v2479_v0  ;;  %1934 = vmatprep.subr.bf16.mxu1 %v2479_v0 }
 0x126   :  { %1915 = vmatpush3.bf16.msra.mxu0 %v2632_v21  ;;  %1935 = vmatpush3.bf16.msra.mxu1 %v2581_v14 }
 0x127   :  { %1916 = vmatprep.subr.bf16.mxu0 %v2479_v0  ;;  %1936 = vmatprep.subr.bf16.mxu1 %v2479_v0 }
 0x12a   :  { %1917 = vmatpush3.bf16.msra.mxu0 %v2636_v22  ;;  %1937 = vmatpush3.bf16.msra.mxu1 %v2587_v15 }
 0x12b   :  { %1942 = vmatprep.subr.bf16.mxu0 %v2479_v0  ;;  %1962 = vmatprep.subr.bf16.mxu1 %v2479_v0 }
 0x1cd   :  { %v2695_v41 = vpop.f32.mrf.mxu0  ;;  %v454_v42 = vpop.f32.mrf.mxu1 }
 0x1ce   :  { %v455_v43 = vadd.f32 %v454_v42, %v163_v40 }
 0x1cf   :  { %v1880_v44 = vpop.f32.mrf.mxu0  ;;  %v1900_v45 = vpop.f32.mrf.mxu1 }
 0x1d0   :  { %v460_v46 = vmax.f32 %v455_v43, 0.0 }
 0x1d1   :  { %v414_v47 = vpop.f32.mrf.mxu0  ;;  %v457_v48 = vpop.f32.mrf.mxu1 }
 0x1d2   :  { %v461_v49 = vpack.c.bf16 %v460_v46, %v460_v46 }
 0x1d3   :  { %v1881_v50 = vpop.f32.mrf.mxu0  ;;  %v1901_v51 = vpop.f32.mrf.mxu1 }
 0x1d4   :  { %1919 = vmatmul.mubr.bf16.vlgmr.msra.gmra.mxu0 %v461_v49  ;;  %1939 = vmatmul.mubr.bf16.vlgmr.msra.gmra.mxu1 %v461_v49 }
 0x1d5   :  { %1943 = vmatpush3.bf16.msra.mxu0 %v2561_v8  ;;  %1963 = vmatpush3.bf16.msra.mxu1 %v2535_v1 }
 0x1d6   :  { %1944 = vmatprep.subr.bf16.mxu0 %v2479_v0  ;;  %1964 = vmatprep.subr.bf16.mxu1 %v2479_v0 }
 0x1d7   :  { %1958 = vmatprep.mubr.msk.bf16.mxu0 %vm2480_vm0, %v2479_v0  ;;  %1978 = vmatprep.mubr.msk.bf16.mxu1 %vm2480_vm0, %v2479_v0 }
 0x1d9   :  { %1945 = vmatpush3.bf16.msra.mxu0 %v2564_v9  ;;  %1965 = vmatpush3.bf16.msra.mxu1 %v2538_v2 }
 0x1da   :  { %1946 = vmatprep.subr.bf16.mxu0 %v2479_v0  ;;  %1966 = vmatprep.subr.bf16.mxu1 %v2479_v0 }
 0x1dd   :  { %1947 = vmatpush3.bf16.msra.mxu0 %v2571_v11  ;;  %1967 = vmatpush3.bf16.msra.mxu1 %v2541_v3 }
 0x1de   :  { %1948 = vmatprep.subr.bf16.mxu0 %v2479_v0  ;;  %1968 = vmatprep.subr.bf16.mxu1 %v2479_v0 }
 0x1e1   :  { %1949 = vmatpush3.bf16.msra.mxu0 %v2579_v13  ;;  %1969 = vmatpush3.bf16.msra.mxu1 %v2557_v7 }
 0x1e2   :  { %1950 = vmatprep.subr.bf16.mxu0 %v2479_v0  ;;  %1970 = vmatprep.subr.bf16.mxu1 %v2479_v0 }
 0x1e5   :  { %1951 = vmatpush3.bf16.msra.mxu0 %v2614_v17  ;;  %1971 = vmatpush3.bf16.msra.mxu1 %v2567_v10 }
 0x1e6   :  { %1952 = vmatprep.subr.bf16.mxu0 %v2479_v0  ;;  %1972 = vmatprep.subr.bf16.mxu1 %v2479_v0 }
 0x1e9   :  { %1953 = vmatpush3.bf16.msra.mxu0 %v2618_v18  ;;  %1973 = vmatpush3.bf16.msra.mxu1 %v2573_v12 }
 0x1ea   :  { %1954 = vmatprep.subr.bf16.mxu0 %v2479_v0  ;;  %1974 = vmatprep.subr.bf16.mxu1 %v2479_v0 }
 0x1ed   :  { %1955 = vmatpush3.bf16.msra.mxu0 %v2632_v21  ;;  %1975 = vmatpush3.bf16.msra.mxu1 %v2581_v14 }
 0x1ee   :  { %1956 = vmatprep.subr.bf16.mxu0 %v2479_v0  ;;  %1976 = vmatprep.subr.bf16.mxu1 %v2479_v0 }
 0x1f1   :  { %1957 = vmatpush3.bf16.msra.mxu0 %v2636_v22  ;;  %1977 = vmatpush3.bf16.msra.mxu1 %v2587_v15 }
 0x1f2   :  { %1982 = vmatprep.subr.bf16.mxu0 %v2479_v0  ;;  %2002 = vmatprep.subr.bf16.mxu1 %v2479_v0 }
 0x294   :  { %v2735_v53 = vpop.f32.mrf.mxu0  ;;  %v540_v54 = vpop.f32.mrf.mxu1 }
 0x295   :  { %v541_v55 = vadd.f32 %v540_v54, %v168_v52 }
 0x296   :  { %v1920_v56 = vpop.f32.mrf.mxu0  ;;  %v1940_v57 = vpop.f32.mrf.mxu1 }
 0x297   :  { %v546_v58 = vmax.f32 %v541_v55, 0.0 }
 0x298   :  { %v499_v59 = vpop.f32.mrf.mxu0  ;;  %v543_v60 = vpop.f32.mrf.mxu1 }
 0x299   :  { %v547_v61 = vpack.c.bf16 %v546_v58, %v546_v58 }
 0x29a   :  { %v1921_v62 = vpop.f32.mrf.mxu0  ;;  %v1941_v63 = vpop.f32.mrf.mxu1 }
 0x29b   :  { %1959 = vmatmul.mubr.bf16.vlgmr.msra.gmra.mxu0 %v547_v61  ;;  %1979 = vmatmul.mubr.bf16.vlgmr.msra.gmra.mxu1 %v547_v61  ;;  %v2897_v61 = vld [vmem:[#allocation7 + $0x78] sm:$0xff]  }
 0x29c   :  { %1983 = vmatpush3.bf16.msra.mxu0 %v2561_v8  ;;  %2003 = vmatpush3.bf16.msra.mxu1 %v2535_v1 }
 0x29d   :  { %1984 = vmatprep.subr.bf16.mxu0 %v2479_v0  ;;  %2004 = vmatprep.subr.bf16.mxu1 %v2479_v0 }
 0x29e   :  { %1998 = vmatprep.mubr.msk.bf16.mxu0 %vm2480_vm0, %v2479_v0  ;;  %2018 = vmatprep.mubr.msk.bf16.mxu1 %vm2480_vm0, %v2479_v0 }
 0x2a0   :  { %1985 = vmatpush3.bf16.msra.mxu0 %v2564_v9  ;;  %2005 = vmatpush3.bf16.msra.mxu1 %v2538_v2 }
 0x2a1   :  { %1986 = vmatprep.subr.bf16.mxu0 %v2479_v0  ;;  %2006 = vmatprep.subr.bf16.mxu1 %v2479_v0 }
 0x2a4   :  { %1987 = vmatpush3.bf16.msra.mxu0 %v2571_v11  ;;  %2007 = vmatpush3.bf16.msra.mxu1 %v2541_v3 }
 0x2a5   :  { %1988 = vmatprep.subr.bf16.mxu0 %v2479_v0  ;;  %2008 = vmatprep.subr.bf16.mxu1 %v2479_v0 }
 0x2a8   :  { %1989 = vmatpush3.bf16.msra.mxu0 %v2579_v13  ;;  %2009 = vmatpush3.bf16.msra.mxu1 %v2557_v7 }
 0x2a9   :  { %1990 = vmatprep.subr.bf16.mxu0 %v2479_v0  ;;  %2010 = vmatprep.subr.bf16.mxu1 %v2479_v0 }
 0x2ac   :  { %1991 = vmatpush3.bf16.msra.mxu0 %v2614_v17  ;;  %2011 = vmatpush3.bf16.msra.mxu1 %v2567_v10 }
 0x2ad   :  { %1992 = vmatprep.subr.bf16.mxu0 %v2479_v0  ;;  %2012 = vmatprep.subr.bf16.mxu1 %v2479_v0 }
 0x2b0   :  { %1993 = vmatpush3.bf16.msra.mxu0 %v2618_v18  ;;  %2013 = vmatpush3.bf16.msra.mxu1 %v2573_v12 }
 0x2b1   :  { %1994 = vmatprep.subr.bf16.mxu0 %v2479_v0  ;;  %2014 = vmatprep.subr.bf16.mxu1 %v2479_v0 }
 0x2b4   :  { %1995 = vmatpush3.bf16.msra.mxu0 %v2632_v21  ;;  %2015 = vmatpush3.bf16.msra.mxu1 %v2581_v14 }
 0x2b5   :  { %1996 = vmatprep.subr.bf16.mxu0 %v2479_v0  ;;  %2016 = vmatprep.subr.bf16.mxu1 %v2479_v0 }
 0x2b8   :  { %1997 = vmatpush3.bf16.msra.mxu0 %v2636_v22  ;;  %2017 = vmatpush3.bf16.msra.mxu1 %v2587_v15 }
 0x2b9   :  { %2022 = vmatprep.subr.bf16.mxu0 %v2479_v0  ;;  %2042 = vmatprep.subr.bf16.mxu1 %v2479_v0 }
 0x35b   :  { %v2775_v5 = vpop.f32.mrf.mxu0  ;;  %v626_v6 = vpop.f32.mrf.mxu1 }
 0x35c   :  { %v627_v19 = vadd.f32 %v626_v6, %v171_v4  ;;  %v2900_v4 = vld [vmem:[#allocation7 + $0x70] sm:$0xff]   ;;  %v2916_v6 = vld [vmem:[#allocation7 + $0x60] sm:$0xff]  }
 0x35d   :  { %v1960_v20 = vpop.f32.mrf.mxu0  ;;  %v1980_v23 = vpop.f32.mrf.mxu1 }
 0x35e   :  { %v632_v25 = vmax.f32 %v627_v19, 0.0 }
 0x35f   :  { %v585_v26 = vpop.f32.mrf.mxu0  ;;  %v629_v27 = vpop.f32.mrf.mxu1 }
 0x360   :  { %v633_v28 = vpack.c.bf16 %v632_v25, %v632_v25 }
 0x361   :  { %v1961_v29 = vpop.f32.mrf.mxu0  ;;  %v1981_v30 = vpop.f32.mrf.mxu1 }
 0x362   :  { %1999 = vmatmul.mubr.bf16.vlgmr.msra.gmra.mxu0 %v633_v28  ;;  %2019 = vmatmul.mubr.bf16.vlgmr.msra.gmra.mxu1 %v633_v28 }
 0x363   :  { %2023 = vmatpush3.bf16.msra.mxu0 %v2561_v8  ;;  %2043 = vmatpush3.bf16.msra.mxu1 %v2535_v1 }
 0x364   :  { %2024 = vmatprep.subr.bf16.mxu0 %v2479_v0  ;;  %2044 = vmatprep.subr.bf16.mxu1 %v2479_v0 }
 0x365   :  { %2038 = vmatprep.mubr.msk.bf16.mxu0 %vm2480_vm0, %v2479_v0  ;;  %2058 = vmatprep.mubr.msk.bf16.mxu1 %vm2480_vm0, %v2479_v0 }
 0x367   :  { %2025 = vmatpush3.bf16.msra.mxu0 %v2564_v9  ;;  %2045 = vmatpush3.bf16.msra.mxu1 %v2538_v2 }
 0x368   :  { %2026 = vmatprep.subr.bf16.mxu0 %v2479_v0  ;;  %2046 = vmatprep.subr.bf16.mxu1 %v2479_v0 }
 0x36b   :  { %2027 = vmatpush3.bf16.msra.mxu0 %v2571_v11  ;;  %2047 = vmatpush3.bf16.msra.mxu1 %v2541_v3 }
 0x36c   :  { %2028 = vmatprep.subr.bf16.mxu0 %v2479_v0  ;;  %2048 = vmatprep.subr.bf16.mxu1 %v2479_v0 }
 0x36f   :  { %2029 = vmatpush3.bf16.msra.mxu0 %v2579_v13  ;;  %2049 = vmatpush3.bf16.msra.mxu1 %v2557_v7 }
 0x370   :  { %2030 = vmatprep.subr.bf16.mxu0 %v2479_v0  ;;  %2050 = vmatprep.subr.bf16.mxu1 %v2479_v0 }
 0x373   :  { %2031 = vmatpush3.bf16.msra.mxu0 %v2614_v17  ;;  %2051 = vmatpush3.bf16.msra.mxu1 %v2567_v10 }
 0x374   :  { %2032 = vmatprep.subr.bf16.mxu0 %v2479_v0  ;;  %2052 = vmatprep.subr.bf16.mxu1 %v2479_v0 }
 0x377   :  { %2033 = vmatpush3.bf16.msra.mxu0 %v2618_v18  ;;  %2053 = vmatpush3.bf16.msra.mxu1 %v2573_v12 }
 0x378   :  { %2034 = vmatprep.subr.bf16.mxu0 %v2479_v0  ;;  %2054 = vmatprep.subr.bf16.mxu1 %v2479_v0 }
 0x37b   :  { %2035 = vmatpush3.bf16.msra.mxu0 %v2632_v21  ;;  %2055 = vmatpush3.bf16.msra.mxu1 %v2581_v14 }
 0x37c   :  { %2036 = vmatprep.subr.bf16.mxu0 %v2479_v0  ;;  %2056 = vmatprep.subr.bf16.mxu1 %v2479_v0 }
 0x37f   :  { %2037 = vmatpush3.bf16.msra.mxu0 %v2636_v22  ;;  %2057 = vmatpush3.bf16.msra.mxu1 %v2587_v15 }
 0x380   :  { %2062 = vmatprep.subr.bf16.mxu0 %v2479_v0  ;;  %2082 = vmatprep.subr.bf16.mxu1 %v2479_v0 }
 0x422   :  { %v2815_v32 = vpop.f32.mrf.mxu0  ;;  %v712_v33 = vpop.f32.mrf.mxu1 }
 0x423   :  { %v713_v34 = vadd.f32 %v712_v33, %v176_v31 }
 0x424   :  { %v2000_v35 = vpop.f32.mrf.mxu0  ;;  %v2020_v40 = vpop.f32.mrf.mxu1 }
 0x425   :  { %v718_v42 = vmax.f32 %v713_v34, 0.0 }
 0x426   :  { %v671_v43 = vpop.f32.mrf.mxu0  ;;  %v715_v44 = vpop.f32.mrf.mxu1 }
 0x427   :  { %v719_v45 = vpack.c.bf16 %v718_v42, %v718_v42 }
 0x428   :  { %v2001_v46 = vpop.f32.mrf.mxu0  ;;  %v2021_v47 = vpop.f32.mrf.mxu1 }
 0x429   :  { %2039 = vmatmul.mubr.bf16.vlgmr.msra.gmra.mxu0 %v719_v45  ;;  %2059 = vmatmul.mubr.bf16.vlgmr.msra.gmra.mxu1 %v719_v45 }
 0x42a   :  { %2063 = vmatpush3.bf16.msra.mxu0 %v2561_v8  ;;  %2083 = vmatpush3.bf16.msra.mxu1 %v2535_v1 }
 0x42b   :  { %2064 = vmatprep.subr.bf16.mxu0 %v2479_v0  ;;  %2084 = vmatprep.subr.bf16.mxu1 %v2479_v0 }
 0x42c   :  { %2078 = vmatprep.mubr.msk.bf16.mxu0 %vm2480_vm0, %v2479_v0  ;;  %2098 = vmatprep.mubr.msk.bf16.mxu1 %vm2480_vm0, %v2479_v0 }
 0x42e   :  { %2065 = vmatpush3.bf16.msra.mxu0 %v2564_v9  ;;  %2085 = vmatpush3.bf16.msra.mxu1 %v2538_v2 }
 0x42f   :  { %2066 = vmatprep.subr.bf16.mxu0 %v2479_v0  ;;  %2086 = vmatprep.subr.bf16.mxu1 %v2479_v0 }
 0x432   :  { %2067 = vmatpush3.bf16.msra.mxu0 %v2571_v11  ;;  %2087 = vmatpush3.bf16.msra.mxu1 %v2541_v3 }
 0x433   :  { %2068 = vmatprep.subr.bf16.mxu0 %v2479_v0  ;;  %2088 = vmatprep.subr.bf16.mxu1 %v2479_v0 }
 0x436   :  { %2069 = vmatpush3.bf16.msra.mxu0 %v2579_v13  ;;  %2089 = vmatpush3.bf16.msra.mxu1 %v2557_v7 }
 0x437   :  { %2070 = vmatprep.subr.bf16.mxu0 %v2479_v0  ;;  %2090 = vmatprep.subr.bf16.mxu1 %v2479_v0 }
 0x43a   :  { %2071 = vmatpush3.bf16.msra.mxu0 %v2614_v17  ;;  %2091 = vmatpush3.bf16.msra.mxu1 %v2567_v10 }
 0x43b   :  { %2072 = vmatprep.subr.bf16.mxu0 %v2479_v0  ;;  %2092 = vmatprep.subr.bf16.mxu1 %v2479_v0 }
 0x43e   :  { %2073 = vmatpush3.bf16.msra.mxu0 %v2618_v18  ;;  %2093 = vmatpush3.bf16.msra.mxu1 %v2573_v12 }
 0x43f   :  { %2074 = vmatprep.subr.bf16.mxu0 %v2479_v0  ;;  %2094 = vmatprep.subr.bf16.mxu1 %v2479_v0 }
 0x442   :  { %2075 = vmatpush3.bf16.msra.mxu0 %v2632_v21  ;;  %2095 = vmatpush3.bf16.msra.mxu1 %v2581_v14 }
 0x443   :  { %2076 = vmatprep.subr.bf16.mxu0 %v2479_v0  ;;  %2096 = vmatprep.subr.bf16.mxu1 %v2479_v0 }
 0x446   :  { %2077 = vmatpush3.bf16.msra.mxu0 %v2636_v22  ;;  %2097 = vmatpush3.bf16.msra.mxu1 %v2587_v15 }
 0x447   :  { %2122 = vmatprep.subr.bf16.mxu1 %v2479_v0  ;;  %2102 = vmatprep.subr.bf16.mxu0 %v2479_v0 }
 0x4e9   :  { %v2855_v48 = vpop.f32.mrf.mxu0  ;;  %v798_v49 = vpop.f32.mrf.mxu1 }
 0x4ea   :  { %v799_v50 = vadd.f32 %v798_v49, %v179_v37 }
 0x4eb   :  { %v2040_v51 = vpop.f32.mrf.mxu0  ;;  %v2060_v52 = vpop.f32.mrf.mxu1 }
 0x4ec   :  { %v804_v54 = vmax.f32 %v799_v50, 0.0 }
 0x4ed   :  { %v757_v55 = vpop.f32.mrf.mxu0  ;;  %v801_v56 = vpop.f32.mrf.mxu1 }
 0x4ee   :  { %v805_v57 = vpack.c.bf16 %v804_v54, %v804_v54 }
 0x4ef   :  { %v2041_v58 = vpop.f32.mrf.mxu0  ;;  %v2061_v59 = vpop.f32.mrf.mxu1 }
 0x4f0   :  { %2079 = vmatmul.mubr.bf16.vlgmr.msra.gmra.mxu0 %v805_v57  ;;  %2099 = vmatmul.mubr.bf16.vlgmr.msra.gmra.mxu1 %v805_v57 }
 0x4f1   :  { %2123 = vmatpush3.bf16.msra.mxu1 %v2535_v1  ;;  %2103 = vmatpush3.bf16.msra.mxu0 %v2561_v8  ;;  %v184_v1 = vadd.f32 %v2686_v36, %v2645_v24  ;;  %v2910_v36 = vld [vmem:[#allocation7 + $0x68] sm:$0xff]  }
 0x4f2   :  { %2124 = vmatprep.subr.bf16.mxu1 %v2479_v0  ;;  %2104 = vmatprep.subr.bf16.mxu0 %v2479_v0 }
 0x4f3   :  { %2118 = vmatprep.mubr.msk.bf16.mxu0 %vm2480_vm0, %v2479_v0  ;;  %2138 = vmatprep.mubr.msk.bf16.mxu1 %vm2480_vm0, %v2479_v0 }
 0x4f5   :  { %2125 = vmatpush3.bf16.msra.mxu1 %v2538_v2  ;;  %2105 = vmatpush3.bf16.msra.mxu0 %v2564_v9 }
 0x4f6   :  { %2126 = vmatprep.subr.bf16.mxu1 %v2479_v0  ;;  %2106 = vmatprep.subr.bf16.mxu0 %v2479_v0 }
 0x4f9   :  { %2127 = vmatpush3.bf16.msra.mxu1 %v2541_v3  ;;  %2107 = vmatpush3.bf16.msra.mxu0 %v2571_v11 }
 0x4fa   :  { %2128 = vmatprep.subr.bf16.mxu1 %v2479_v0  ;;  %2108 = vmatprep.subr.bf16.mxu0 %v2479_v0 }
 0x4fd   :  { %2129 = vmatpush3.bf16.msra.mxu1 %v2557_v7  ;;  %2109 = vmatpush3.bf16.msra.mxu0 %v2579_v13 }
 0x4fe   :  { %2130 = vmatprep.subr.bf16.mxu1 %v2479_v0  ;;  %2110 = vmatprep.subr.bf16.mxu0 %v2479_v0 }
 0x501   :  { %2131 = vmatpush3.bf16.msra.mxu1 %v2567_v10  ;;  %2111 = vmatpush3.bf16.msra.mxu0 %v2614_v17 }
 0x502   :  { %2132 = vmatprep.subr.bf16.mxu1 %v2479_v0  ;;  %2112 = vmatprep.subr.bf16.mxu0 %v2479_v0 }
 0x505   :  { %2133 = vmatpush3.bf16.msra.mxu1 %v2573_v12  ;;  %2113 = vmatpush3.bf16.msra.mxu0 %v2618_v18 }
 0x506   :  { %2134 = vmatprep.subr.bf16.mxu1 %v2479_v0  ;;  %2114 = vmatprep.subr.bf16.mxu0 %v2479_v0 }
 0x509   :  { %2135 = vmatpush3.bf16.msra.mxu1 %v2581_v14  ;;  %2115 = vmatpush3.bf16.msra.mxu0 %v2632_v21 }
 0x50a   :  { %2136 = vmatprep.subr.bf16.mxu1 %v2479_v0  ;;  %2116 = vmatprep.subr.bf16.mxu0 %v2479_v0 }
 0x50d   :  { %2137 = vmatpush3.bf16.msra.mxu1 %v2587_v15  ;;  %2117 = vmatpush3.bf16.msra.mxu0 %v2636_v22 }
 0x50e   :  { %2162 = vmatprep.subr.bf16.mxu1 %v2479_v0  ;;  %2142 = vmatprep.subr.bf16.mxu0 %v2479_v0 }
 0x5b0   :  { %v2895_v2 = vpop.f32.mrf.mxu0  ;;  %v884_v3 = vpop.f32.mrf.mxu1 }
 0x5b1   :  { %v885_v7 = vadd.f32 %v884_v3, %v184_v1 }
 0x5b2   :  { %v2080_v10 = vpop.f32.mrf.mxu0  ;;  %v2100_v12 = vpop.f32.mrf.mxu1 }
 0x5b3   :  { %v890_v14 = vmax.f32 %v885_v7, 0.0 }
 0x5b4   :  { %v843_v39 = vpop.f32.mrf.mxu0  ;;  %v887_v60 = vpop.f32.mrf.mxu1 }
 0x5b5   :  { %v891_v15 = vpack.c.bf16 %v890_v14, %v890_v14 }
 0x5b6   :  { %v2081_v62 = vpop.f32.mrf.mxu0  ;;  %v2101_v63 = vpop.f32.mrf.mxu1 }
 0x5b7   :  { %2119 = vmatmul.mubr.bf16.vlgmr.msra.gmra.mxu0 %v891_v15  ;;  %2139 = vmatmul.mubr.bf16.vlgmr.msra.gmra.mxu1 %v891_v15 }
 0x5b8   :  { %2163 = vmatpush3.bf16.msra.mxu1 %v2897_v61  ;;  %2178 = vmatprep.mubr.msk.bf16.mxu1 %vm2480_vm0, %v2479_v0 }
 0x5b9   :  { %2164 = vmatprep.subr.bf16.mxu1 %v2479_v0  ;;  %2143 = vmatpush3.bf16.msra.mxu0 %v2561_v8  ;;  %v2922_v8 = vld [vmem:[#allocation7 + $0x58] sm:$0xff]  }
 0x5ba   :  { %2144 = vmatprep.subr.bf16.mxu0 %v2479_v0  ;;  %2158 = vmatprep.mubr.msk.bf16.mxu0 %vm2480_vm0, %v2479_v0 }
 0x5bc   :  { %2165 = vmatpush3.bf16.msra.mxu1 %v2900_v4 }
 0x5bd   :  { %2166 = vmatprep.subr.bf16.mxu1 %v2479_v0  ;;  %2145 = vmatpush3.bf16.msra.mxu0 %v2564_v9  ;;  %v2928_v9 = vld [vmem:[#allocation7 + $0x50] sm:$0xff]  }
 0x5be   :  { %2146 = vmatprep.subr.bf16.mxu0 %v2479_v0 }
 0x5c0   :  { %2167 = vmatpush3.bf16.msra.mxu1 %v2910_v36 }
 0x5c1   :  { %2168 = vmatprep.subr.bf16.mxu1 %v2479_v0  ;;  %2147 = vmatpush3.bf16.msra.mxu0 %v2571_v11  ;;  %v2934_v11 = vld [vmem:[#allocation7 + $0x48] sm:$0xff]  }
 0x5c2   :  { %2148 = vmatprep.subr.bf16.mxu0 %v2479_v0 }
 0x5c4   :  { %2169 = vmatpush3.bf16.msra.mxu1 %v2916_v6 }
 0x5c5   :  { %2170 = vmatprep.subr.bf16.mxu1 %v2479_v0  ;;  %2149 = vmatpush3.bf16.msra.mxu0 %v2579_v13  ;;  %v2940_v13 = vld [vmem:[#allocation7 + $0x40] sm:$0xff]  }
 0x5c6   :  { %2150 = vmatprep.subr.bf16.mxu0 %v2479_v0 }
 0x5c8   :  { %2171 = vmatpush3.bf16.msra.mxu1 %v2922_v8 }
 0x5c9   :  { %2172 = vmatprep.subr.bf16.mxu1 %v2479_v0  ;;  %2151 = vmatpush3.bf16.msra.mxu0 %v2614_v17 }
 0x5ca   :  { %2152 = vmatprep.subr.bf16.mxu0 %v2479_v0 }
 0x5cc   :  { %2173 = vmatpush3.bf16.msra.mxu1 %v2928_v9 }
 0x5cd   :  { %2174 = vmatprep.subr.bf16.mxu1 %v2479_v0  ;;  %2153 = vmatpush3.bf16.msra.mxu0 %v2618_v18 }
 0x5ce   :  { %2154 = vmatprep.subr.bf16.mxu0 %v2479_v0 }
 0x5d0   :  { %2175 = vmatpush3.bf16.msra.mxu1 %v2934_v11 }
 0x5d1   :  { %2176 = vmatprep.subr.bf16.mxu1 %v2479_v0  ;;  %2155 = vmatpush3.bf16.msra.mxu0 %v2632_v21 }
 0x5d2   :  { %2156 = vmatprep.subr.bf16.mxu0 %v2479_v0 }
 0x5d4   :  { %2177 = vmatpush3.bf16.msra.mxu1 %v2940_v13 }
 0x5d5   :  { %2157 = vmatpush3.bf16.msra.mxu0 %v2636_v22  ;;  %2202 = vmatprep.subr.bf16.mxu1 %v2479_v0 }
 0x5d6   :  { %2182 = vmatprep.subr.bf16.mxu0 %v2479_v0 }
 0x5d7   :  { %2179 = vmatmul.mubr.bf16.vlgmr.msra.gmra.mxu1 %v2481_v16  ;;  %v187_v16 = vadd.f32 %v2690_v38, %v2645_v24  ;;  %v2987_v24 = vld [vmem:[%s3121_s4 + $0x1] ss:$0 sm:$0xff] }
 0x5d8   :  { %2203 = vmatpush3.bf16.msra.mxu1 %v2897_v61  ;;  %2218 = vmatprep.mubr.msk.bf16.mxu1 %vm2480_vm0, %v2479_v0  ;;  %v412_v38 = vadd.f32 %v2987_v24, %v2695_v41  ;;  %v497_v45 = vadd.f32 %v2987_v24, %v2735_v53  ;;  %v583_v53 = vadd.f32 %v2987_v24, %v2775_v5 }
 0x5d9   :  { %2204 = vmatprep.subr.bf16.mxu1 %v2479_v0  ;;  %v669_v5 = vadd.f32 %v2987_v24, %v2815_v32  ;;  %v755_v32 = vadd.f32 %v2987_v24, %v2855_v48  ;;  %v841_v48 = vadd.f32 %v2987_v24, %v2895_v2  ;;  %v2383_v2 = vld [vmem:[#allocation9 + $0x20] sm:$0xff]  }
 0x5dc   :  { %2205 = vmatpush3.bf16.msra.mxu1 %v2900_v4 }
 0x5dd   :  { %2206 = vmatprep.subr.bf16.mxu1 %v2479_v0 }
 0x5e0   :  { %2207 = vmatpush3.bf16.msra.mxu1 %v2910_v36 }
 0x5e1   :  { %2208 = vmatprep.subr.bf16.mxu1 %v2479_v0 }
 0x5e4   :  { %2209 = vmatpush3.bf16.msra.mxu1 %v2916_v6 }
 0x5e5   :  { %2210 = vmatprep.subr.bf16.mxu1 %v2479_v0 }
 0x5e8   :  { %2211 = vmatpush3.bf16.msra.mxu1 %v2922_v8 }
 0x5e9   :  { %2212 = vmatprep.subr.bf16.mxu1 %v2479_v0 }
 0x5ec   :  { %2213 = vmatpush3.bf16.msra.mxu1 %v2928_v9 }
 0x5ed   :  { %2214 = vmatprep.subr.bf16.mxu1 %v2479_v0 }
 0x5f0   :  { %2215 = vmatpush3.bf16.msra.mxu1 %v2934_v11 }
 0x5f1   :  { %2216 = vmatprep.subr.bf16.mxu1 %v2479_v0 }
 0x5f4   :  { %2217 = vmatpush3.bf16.msra.mxu1 %v2940_v13 }
 0x5f5   :  { %2242 = vmatprep.subr.bf16.mxu1 %v2479_v0 }
 0x677   :  { %v2970_v17 = vpop.f32.mrf.mxu0  ;;  %v970_v18 = vpop.f32.mrf.mxu1 }
 0x678   :  { %v971_v21 = vadd.f32 %v970_v18, %v187_v16 }
 0x679   :  { %v2120_v22 = vpop.f32.mrf.mxu0  ;;  %v2140_v19 = vpop.f32.mrf.mxu1 }
 0x67a   :  { %v976_v20 = vmax.f32 %v971_v21, 0.0 }
 0x67b   :  { %v929_v23 = vpop.f32.mrf.mxu0  ;;  %v973_v25 = vpop.f32.mrf.mxu1 }
 0x67c   :  { %v977_v26 = vpack.c.bf16 %v976_v20, %v976_v20  ;;  %v2384_v23 = vld [vmem:[#allocation9 + $0x18] sm:$0xff]   ;;  %v2385_v25 = vld [vmem:[#allocation9 + $0x10] sm:$0xff]  }
 0x67d   :  { %v2121_v27 = vpop.f32.mrf.mxu0  ;;  %v2141_v28 = vpop.f32.mrf.mxu1 }
 0x67e   :  { %2159 = vmatmul.mubr.bf16.vlgmr.msra.gmra.mxu0 %v977_v26  ;;  %v927_v26 = vadd.f32 %v2987_v24, %v2970_v17 }
 0x67f   :  { %2183 = vmatpush3.bf16.msra.mxu0 %v2897_v61  ;;  %2198 = vmatprep.mubr.msk.bf16.mxu0 %vm2480_vm0, %v2479_v0 }
 0x680   :  { %2184 = vmatprep.subr.bf16.mxu0 %v2479_v0 }
 0x683   :  { %2185 = vmatpush3.bf16.msra.mxu0 %v2900_v4 }
 0x684   :  { %2186 = vmatprep.subr.bf16.mxu0 %v2479_v0 }
 0x687   :  { %2187 = vmatpush3.bf16.msra.mxu0 %v2910_v36 }
 0x688   :  { %2188 = vmatprep.subr.bf16.mxu0 %v2479_v0 }
 0x68b   :  { %2189 = vmatpush3.bf16.msra.mxu0 %v2916_v6 }
 0x68c   :  { %2190 = vmatprep.subr.bf16.mxu0 %v2479_v0 }
 0x68f   :  { %2191 = vmatpush3.bf16.msra.mxu0 %v2922_v8 }
 0x690   :  { %2192 = vmatprep.subr.bf16.mxu0 %v2479_v0 }
 0x693   :  { %2193 = vmatpush3.bf16.msra.mxu0 %v2928_v9 }
 0x694   :  { %2194 = vmatprep.subr.bf16.mxu0 %v2479_v0 }
 0x697   :  { %v1120_v29 = vpop.f32.mrf.mxu1  ;;  %2195 = vmatpush3.bf16.msra.mxu0 %v2934_v11 }
 0x698   :  { %v1121_v30 = vadd.f32 %v1120_v29, %v412_v38  ;;  %2196 = vmatprep.subr.bf16.mxu0 %v2479_v0 }
 0x699   :  { %v2180_v31 = vpop.f32.mrf.mxu1 }
 0x69a   :  { %v1126_v33 = vmax.f32 %v1121_v30, 0.0 }
 0x69b   :  { %v1123_v34 = vpop.f32.mrf.mxu1  ;;  %2197 = vmatpush3.bf16.msra.mxu0 %v2940_v13 }
 0x69c   :  { %v1128_v35 = vpack.c.bf16 %v1126_v33, %v1126_v33  ;;  %2222 = vmatprep.subr.bf16.mxu0 %v2479_v0  ;;  %v2386_v34 = vld [vmem:[#allocation9 + $0x8] sm:$0xff]  }
 0x69d   :  { %v2181_v40 = vpop.f32.mrf.mxu1 }
 0x69e   :  { %2199 = vmatmul.mubr.bf16.vlgmr.msra.gmra.mxu0 %v1128_v35  ;;  %v2387_v35 = vld [vmem:[#allocation9] sm:$0xff]  }
 0x69f   :  { %2223 = vmatpush3.bf16.msra.mxu0 %v2897_v61  ;;  %2238 = vmatprep.mubr.msk.bf16.mxu0 %vm2480_vm0, %v2479_v0 }
 0x6a0   :  { %2224 = vmatprep.subr.bf16.mxu0 %v2479_v0 }
 0x6a3   :  { %2225 = vmatpush3.bf16.msra.mxu0 %v2900_v4 }
 0x6a4   :  { %2226 = vmatprep.subr.bf16.mxu0 %v2479_v0 }
 0x6a7   :  { %2227 = vmatpush3.bf16.msra.mxu0 %v2910_v36 }
 0x6a8   :  { %2228 = vmatprep.subr.bf16.mxu0 %v2479_v0 }
 0x6ab   :  { %2229 = vmatpush3.bf16.msra.mxu0 %v2916_v6 }
 0x6ac   :  { %2230 = vmatprep.subr.bf16.mxu0 %v2479_v0 }
 0x6af   :  { %2231 = vmatpush3.bf16.msra.mxu0 %v2922_v8 }
 0x6b0   :  { %2232 = vmatprep.subr.bf16.mxu0 %v2479_v0 }
 0x6b3   :  { %2233 = vmatpush3.bf16.msra.mxu0 %v2928_v9 }
 0x6b4   :  { %2234 = vmatprep.subr.bf16.mxu0 %v2479_v0 }
 0x6b7   :  { %2235 = vmatpush3.bf16.msra.mxu0 %v2934_v11 }
 0x6b8   :  { %2236 = vmatprep.subr.bf16.mxu0 %v2479_v0 }
 0x6bb   :  { %2237 = vmatpush3.bf16.msra.mxu0 %v2940_v13 }
 0x6bc   :  { %2262 = vmatprep.subr.bf16.mxu0 %v2479_v0 }
 0x73e   :  { %v3015_v41 = vpop.f32.mrf.mxu0 }
 0x73f   :  { %v1013_v40 = vadd.f32 %v2987_v24, %v3015_v41 }
 0x740   :  { %v2160_v42 = vpop.f32.mrf.mxu0 }
 0x742   :  { %v1015_v43 = vpop.f32.mrf.mxu0 }
 0x744   :  { %v2161_v44 = vpop.f32.mrf.mxu0 }
 0x75e   :  { %v1163_v46 = vpop.f32.mrf.mxu0 }
 0x75f   :  { %v1164_v47 = vadd.f32 %v1163_v46, %v497_v45 }
 0x760   :  { %v2200_v37 = vpop.f32.mrf.mxu0 }
 0x761   :  { %v1169_v49 = vmax.f32 %v1164_v47, 0.0  ;;  %v1593_v37 = vld [vmem:[%s3123_s6] ss:$0 sm:$0xff] }
 0x762   :  { %v1166_v50 = vpop.f32.mrf.mxu0 }
 0x763   :  { %v1171_v51 = vpack.c.bf16 %v1169_v49, %v1169_v49 }
 0x764   :  { %v2201_v52 = vpop.f32.mrf.mxu0 }
 0x765   :  { %2219 = vmatmul.mubr.bf16.vlgmr.msra.gmra.mxu1 %v1171_v51 }
 0x766   :  { %2243 = vmatpush3.bf16.msra.mxu1 %v2897_v61  ;;  %2258 = vmatprep.mubr.msk.bf16.mxu1 %vm2480_vm0, %v2479_v0 }
 0x767   :  { %2244 = vmatprep.subr.bf16.mxu1 %v2479_v0 }
 0x76a   :  { %2245 = vmatpush3.bf16.msra.mxu1 %v2900_v4 }
 0x76b   :  { %2246 = vmatprep.subr.bf16.mxu1 %v2479_v0 }
 0x76e   :  { %2247 = vmatpush3.bf16.msra.mxu1 %v2910_v36 }
 0x76f   :  { %2248 = vmatprep.subr.bf16.mxu1 %v2479_v0 }
 0x772   :  { %2249 = vmatpush3.bf16.msra.mxu1 %v2916_v6 }
 0x773   :  { %2250 = vmatprep.subr.bf16.mxu1 %v2479_v0 }
 0x776   :  { %2251 = vmatpush3.bf16.msra.mxu1 %v2922_v8 }
 0x777   :  { %2252 = vmatprep.subr.bf16.mxu1 %v2479_v0 }
 0x77a   :  { %2253 = vmatpush3.bf16.msra.mxu1 %v2928_v9 }
 0x77b   :  { %2254 = vmatprep.subr.bf16.mxu1 %v2479_v0 }
 0x77e   :  { %2255 = vmatpush3.bf16.msra.mxu1 %v2934_v11 }
 0x77f   :  { %2256 = vmatprep.subr.bf16.mxu1 %v2479_v0 }
 0x782   :  { %2257 = vmatpush3.bf16.msra.mxu1 %v2940_v13 }
 0x783   :  { %2282 = vmatprep.subr.bf16.mxu1 %v2479_v0 }
 0x825   :  { %v1206_v54 = vpop.f32.mrf.mxu1 }
 0x826   :  { %v1207_v55 = vadd.f32 %v1206_v54, %v583_v53 }
 0x827   :  { %v2220_v56 = vpop.f32.mrf.mxu1 }
 0x828   :  { %v1212_v57 = vmax.f32 %v1207_v55, 0.0 }
 0x829   :  { %v1209_v58 = vpop.f32.mrf.mxu1 }
 0x82a   :  { %v1214_v59 = vpack.c.bf16 %v1212_v57, %v1212_v57 }
 0x82b   :  { %v2221_v1 = vpop.f32.mrf.mxu1 }
 0x82c   :  { %2239 = vmatmul.mubr.bf16.vlgmr.msra.gmra.mxu0 %v1214_v59 }
 0x82d   :  { %2263 = vmatpush3.bf16.msra.mxu0 %v2897_v61  ;;  %2278 = vmatprep.mubr.msk.bf16.mxu0 %vm2480_vm0, %v2479_v0 }
 0x82e   :  { %2264 = vmatprep.subr.bf16.mxu0 %v2479_v0 }
 0x831   :  { %2265 = vmatpush3.bf16.msra.mxu0 %v2900_v4 }
 0x832   :  { %2266 = vmatprep.subr.bf16.mxu0 %v2479_v0 }
 0x835   :  { %2267 = vmatpush3.bf16.msra.mxu0 %v2910_v36 }
 0x836   :  { %2268 = vmatprep.subr.bf16.mxu0 %v2479_v0 }
 0x839   :  { %2269 = vmatpush3.bf16.msra.mxu0 %v2916_v6 }
 0x83a   :  { %2270 = vmatprep.subr.bf16.mxu0 %v2479_v0 }
 0x83d   :  { %2271 = vmatpush3.bf16.msra.mxu0 %v2922_v8 }
 0x83e   :  { %2272 = vmatprep.subr.bf16.mxu0 %v2479_v0 }
 0x841   :  { %2273 = vmatpush3.bf16.msra.mxu0 %v2928_v9 }
 0x842   :  { %2274 = vmatprep.subr.bf16.mxu0 %v2479_v0 }
 0x845   :  { %2275 = vmatpush3.bf16.msra.mxu0 %v2934_v11 }
 0x846   :  { %2276 = vmatprep.subr.bf16.mxu0 %v2479_v0 }
 0x849   :  { %2277 = vmatpush3.bf16.msra.mxu0 %v2940_v13 }
 0x84a   :  { %2302 = vmatprep.subr.bf16.mxu0 %v2479_v0 }
 0x8ec   :  { %v1249_v3 = vpop.f32.mrf.mxu0 }
 0x8ed   :  { %v1250_v7 = vadd.f32 %v1249_v3, %v669_v5 }
 0x8ee   :  { %v2240_v10 = vpop.f32.mrf.mxu0 }
 0x8ef   :  { %v1255_v12 = vmax.f32 %v1250_v7, 0.0 }
 0x8f0   :  { %v1252_v14 = vpop.f32.mrf.mxu0 }
 0x8f1   :  { %v1257_v39 = vpack.c.bf16 %v1255_v12, %v1255_v12 }
 0x8f2   :  { %v2241_v60 = vpop.f32.mrf.mxu0 }
 0x8f3   :  { %2259 = vmatmul.mubr.bf16.vlgmr.msra.gmra.mxu1 %v1257_v39 }
 0x8f4   :  { %2283 = vmatpush3.bf16.msra.mxu1 %v2897_v61  ;;  %2298 = vmatprep.mubr.msk.bf16.mxu1 %vm2480_vm0, %v2479_v0 }
 0x8f5   :  { %2284 = vmatprep.subr.bf16.mxu1 %v2479_v0 }
 0x8f8   :  { %2285 = vmatpush3.bf16.msra.mxu1 %v2900_v4 }
 0x8f9   :  { %2286 = vmatprep.subr.bf16.mxu1 %v2479_v0 }
 0x8fc   :  { %2287 = vmatpush3.bf16.msra.mxu1 %v2910_v36 }
 0x8fd   :  { %2288 = vmatprep.subr.bf16.mxu1 %v2479_v0 }
 0x900   :  { %2289 = vmatpush3.bf16.msra.mxu1 %v2916_v6 }
 0x901   :  { %2290 = vmatprep.subr.bf16.mxu1 %v2479_v0 }
 0x904   :  { %2291 = vmatpush3.bf16.msra.mxu1 %v2922_v8 }
 0x905   :  { %2292 = vmatprep.subr.bf16.mxu1 %v2479_v0 }
 0x908   :  { %2293 = vmatpush3.bf16.msra.mxu1 %v2928_v9 }
 0x909   :  { %2294 = vmatprep.subr.bf16.mxu1 %v2479_v0 }
 0x90c   :  { %2295 = vmatpush3.bf16.msra.mxu1 %v2934_v11 }
 0x90d   :  { %2296 = vmatprep.subr.bf16.mxu1 %v2479_v0 }
 0x910   :  { %2297 = vmatpush3.bf16.msra.mxu1 %v2940_v13 }
 0x911   :  { %2322 = vmatprep.subr.bf16.mxu1 %v2479_v0 }
 0x9b3   :  { %v1292_v15 = vpop.f32.mrf.mxu1 }
 0x9b4   :  { %v1293_v62 = vadd.f32 %v1292_v15, %v755_v32 }
 0x9b5   :  { %v2260_v63 = vpop.f32.mrf.mxu1 }
 0x9b6   :  { %v1298_v16 = vmax.f32 %v1293_v62, 0.0 }
 0x9b7   :  { %v1295_v18 = vpop.f32.mrf.mxu1 }
 0x9b8   :  { %v1300_v21 = vpack.c.bf16 %v1298_v16, %v1298_v16 }
 0x9b9   :  { %v2261_v22 = vpop.f32.mrf.mxu1 }
 0x9ba   :  { %2279 = vmatmul.mubr.bf16.vlgmr.msra.gmra.mxu0 %v1300_v21 }
 0x9bb   :  { %2303 = vmatpush3.bf16.msra.mxu0 %v2897_v61  ;;  %2318 = vmatprep.mubr.msk.bf16.mxu0 %vm2480_vm0, %v2479_v0 }
 0x9bc   :  { %2304 = vmatprep.subr.bf16.mxu0 %v2479_v0 }
 0x9bf   :  { %2305 = vmatpush3.bf16.msra.mxu0 %v2900_v4 }
 0x9c0   :  { %2306 = vmatprep.subr.bf16.mxu0 %v2479_v0 }
 0x9c3   :  { %2307 = vmatpush3.bf16.msra.mxu0 %v2910_v36 }
 0x9c4   :  { %2308 = vmatprep.subr.bf16.mxu0 %v2479_v0 }
 0x9c7   :  { %2309 = vmatpush3.bf16.msra.mxu0 %v2916_v6 }
 0x9c8   :  { %2310 = vmatprep.subr.bf16.mxu0 %v2479_v0 }
 0x9cb   :  { %2311 = vmatpush3.bf16.msra.mxu0 %v2922_v8 }
 0x9cc   :  { %2312 = vmatprep.subr.bf16.mxu0 %v2479_v0 }
 0x9cf   :  { %2313 = vmatpush3.bf16.msra.mxu0 %v2928_v9  ;;  %v2380_v9 = vld [vmem:[#allocation9 + $0x38] sm:$0xff]  }
 0x9d0   :  { %2314 = vmatprep.subr.bf16.mxu0 %v2479_v0 }
 0x9d3   :  { %2315 = vmatpush3.bf16.msra.mxu0 %v2934_v11  ;;  %v2381_v11 = vld [vmem:[#allocation9 + $0x30] sm:$0xff]  }
 0x9d4   :  { %2316 = vmatprep.subr.bf16.mxu0 %v2479_v0 }
 0x9d7   :  { %2317 = vmatpush3.bf16.msra.mxu0 %v2940_v13  ;;  %v2382_v13 = vld [vmem:[#allocation9 + $0x28] sm:$0xff]  }
 0xa7a   :  { %v1335_v61 = vpop.f32.mrf.mxu0 }
 0xa7b   :  { %v1336_v4 = vadd.f32 %v1335_v61, %v841_v48 }
 0xa7c   :  { %v2280_v36 = vpop.f32.mrf.mxu0 }
 0xa7d   :  { %v1341_v6 = vmax.f32 %v1336_v4, 0.0 }
 0xa7e   :  { %v1338_v8 = vpop.f32.mrf.mxu0 }
 0xa7f   :  { %v1343_v19 = vpack.c.bf16 %v1341_v6, %v1341_v6 }
 0xa80   :  { %v2281_v20 = vpop.f32.mrf.mxu0 }
 0xa81   :  { %2299 = vmatmul.mubr.bf16.vlgmr.msra.gmra.mxu1 %v1343_v19 }
 0xa82   :  { %2338 = vmatprep.mubr.msk.bf16.mxu1 %vm2480_vm0, %v2479_v0  ;;  %2323 = vmatpush3.bf16.msra.mxu1 %v2380_v9 }
 0xa83   :  { %2324 = vmatprep.subr.bf16.mxu1 %v2479_v0 }
 0xa86   :  { %2325 = vmatpush3.bf16.msra.mxu1 %v2381_v11 }
 0xa87   :  { %2326 = vmatprep.subr.bf16.mxu1 %v2479_v0 }
 0xa8a   :  { %2327 = vmatpush3.bf16.msra.mxu1 %v2382_v13 }
 0xa8b   :  { %2328 = vmatprep.subr.bf16.mxu1 %v2479_v0 }
 0xa8e   :  { %2329 = vmatpush3.bf16.msra.mxu1 %v2383_v2 }
 0xa8f   :  { %2330 = vmatprep.subr.bf16.mxu1 %v2479_v0 }
 0xa92   :  { %2331 = vmatpush3.bf16.msra.mxu1 %v2384_v23 }
 0xa93   :  { %2332 = vmatprep.subr.bf16.mxu1 %v2479_v0 }
 0xa96   :  { %2333 = vmatpush3.bf16.msra.mxu1 %v2385_v25 }
 0xa97   :  { %2334 = vmatprep.subr.bf16.mxu1 %v2479_v0 }
 0xa9a   :  { %2335 = vmatpush3.bf16.msra.mxu1 %v2386_v34 }
 0xa9b   :  { %2336 = vmatprep.subr.bf16.mxu1 %v2479_v0 }
 0xa9e   :  { %2337 = vmatpush3.bf16.msra.mxu1 %v2387_v35 }
 0xb41   :  { %v1378_v27 = vpop.f32.mrf.mxu1 }
 0xb42   :  { %v1379_v28 = vadd.f32 %v1378_v27, %v927_v26 }
 0xb43   :  { %v2300_v38 = vpop.f32.mrf.mxu1 }
 0xb44   :  { %v1384_v29 = vmax.f32 %v1379_v28, 0.0 }
 0xb45   :  { %v1381_v30 = vpop.f32.mrf.mxu1 }
 0xb46   :  { %v1386_v31 = vpack.c.bf16 %v1384_v29, %v1384_v29 }
 0xb47   :  { %v2301_v33 = vpop.f32.mrf.mxu1 }
 0xb48   :  { %2319 = vmatmul.mubr.bf16.vlgmr.msra.gmra.mxu0 %v1386_v31 }
 0xc08   :  { %v1421_v42 = vpop.f32.mrf.mxu0 }
 0xc09   :  { %v1422_v43 = vadd.f32 %v1421_v42, %v1013_v40 }
 0xc0a   :  { %v2320_v17 = vpop.f32.mrf.mxu0 }
 0xc0b   :  { %v1427_v44 = vmax.f32 %v1422_v43, 0.0 }
 0xc0c   :  { %v1424_v45 = vpop.f32.mrf.mxu0 }
 0xc0d   :  { %v1428_v46 = vpack.c.bf16 %v1427_v44, %v1427_v44 }
 0xc0e   :  { %v2321_v47 = vpop.f32.mrf.mxu0 }
 0xc0f   :  { %2339 = vmatmul.mubr.bf16.vlgmr.msra.gmra.mxu1 %v1428_v46 }
 0xccf   :  { %v1534_v0 = vpop.f32.mrf.mxu1 }
 0xcd0   :  { %v1535_v49 = vadd.f32 %v1593_v37, %v1534_v0 }
 0xcd1   :  { %v2340_v50 = vpop.f32.mrf.mxu1 }
 0xcd2   :  { %1540 = vst [vmem:[#allocation10] sm:$0xff] %v1535_v49 }
 0xcd3   :  { %v1537_v24 = vpop.f32.mrf.mxu1 }
 0xcd4   :  { %2459 = shalt.err (!%p2456_p5)
}
 0xcd5   :  { %1550 = dma.vmem_to_hbm [thread:$0]  %s1548_s29, 128, %s3124_s7, [#allocation6]   ;;  %v2341_v41 = vpop.f32.mrf.mxu1 }
 0xcd6   :  { %2472 = dma.done.wait [#allocation6], 128  }
 0xcd7   :  { %2473 = vsyncadd [#allocation6], 4294967168 }
 0xcd8   :  { %1554 = vsyncpa [#allocation5], 1 }
 0xcd9   :  { %1555 = vsyncpa [#allocation8], 1 }
 0xcda   :  { %1556 = vsyncpa [#allocation6], 1 }

</bundles_post_ra>
